<compile_context>
chip_gen: v6e
topology: v6e:2x2x1
jax: 0.10.0
libtpu: 0.0.40
codegen_flags: <defaults>
</compile_context>

<pallas_src>
import jax
import jax.numpy as jnp
from jax.experimental import pallas as pl
from jax.experimental.pallas import tpu as pltpu

HIDDEN_SIZE = 32
NUM_LAYERS = 2  # hard-wired below as two stacked cells per time step


def _lstm_kernel(x2d_ref, wih0_ref, whh0_ref, b0_ref, w1_ref, b1_ref,
                 wfc_ref, bfc_ref, out_ref):
    # x2d:  (T*B, I)  bf16   time-major, flattened
    # wih0: (I, 4H)   bf16   whh0: (H, 4H) bf16   b0: (1, 4H) f32 (b_ih+b_hh)
    # w1:   (2H, 4H)  bf16   stacked [W_ih_l1; W_hh_l1]          b1: (1, 4H) f32
    # wfc:  (H, Opad) bf16   bfc: (1, Opad) f32
    # out:  (B, Opad) f32
    B = out_ref.shape[0]
    T = x2d_ref.shape[0] // B
    H = whh0_ref.shape[0]

    whh0 = whh0_ref[...]                       # (H, 4H)  bf16
    w1 = w1_ref[...]                           # (2H, 4H) bf16

    # Layer-0 input projection for ALL timesteps in one batched matmul,
    # bias folded in here (off the recurrent critical path).
    xp0 = (jnp.dot(x2d_ref[...], wih0_ref[...],
                   preferred_element_type=jnp.float32)
           + b0_ref[...])                      # (T*B, 4H) f32

    # Hoist the layer-1 bias broadcast out of the loop.
    b1b = jnp.broadcast_to(b1_ref[...], (B, 4 * H))

    def gates_to_hc(gates, c):
        # Full-width (B, 4H) transcendentals, then slice into i/f/g/o.
        sig = jax.nn.sigmoid(gates)
        tng = jnp.tanh(gates)
        i_g = sig[:, 0:H]
        f_g = sig[:, H:2 * H]
        g_g = tng[:, 2 * H:3 * H]
        o_g = sig[:, 3 * H:4 * H]
        c_new = f_g * c + i_g * g_g
        h_new = o_g * jnp.tanh(c_new)
        return h_new, c_new

    zeros = jnp.zeros((B, H), jnp.float32)
    h0, c0, h1, c1 = zeros, zeros, zeros, zeros

    # Fully unrolled recurrence (T is static and small): every index is static
    # and the scheduler sees across steps.
    for t in range(T):
        # Layer 0: only the recurrent matmul remains on the serial chain.
        g0 = xp0[t * B:(t + 1) * B, :] + jnp.dot(
            h0.astype(jnp.bfloat16), whh0, preferred_element_type=jnp.float32)
        h0, c0 = gates_to_hc(g0, c0)

        # Layer 1: one fused matmul of concat([h0_new, h1_prev]) @ [wih1; whh1].
        a1 = jnp.concatenate(
            [h0.astype(jnp.bfloat16), h1.astype(jnp.bfloat16)], axis=1)  # (B, 2H)
        g1 = jnp.dot(a1, w1, preferred_element_type=jnp.float32) + b1b
        h1, c1 = gates_to_hc(g1, c1)

    # FC head on the last timestep of the top layer (== lstm_out[:, -1, :]).
    # Output is lane-dense (Opad = multiple of 128); wrapper slices to O.
    out = (jnp.dot(h1.astype(jnp.bfloat16), wfc_ref[...],
                   preferred_element_type=jnp.float32)
           + bfc_ref[...])
    out_ref[...] = out.astype(out_ref.dtype)


def init_params(key, input_size, hidden_size, output_size):
    """Deterministic init mimicking PyTorch's U(-1/sqrt(H), 1/sqrt(H)), torch shapes."""
    bound = 1.0 / float(hidden_size) ** 0.5
    keys = jax.random.split(key, 10)

    def u(k, shape):
        return jax.random.uniform(k, shape, jnp.float32, -bound, bound)

    H4 = 4 * hidden_size
    return {
        "w_ih_l0": u(keys[0], (H4, input_size)),
        "w_hh_l0": u(keys[1], (H4, hidden_size)),
        "b_ih_l0": u(keys[2], (H4,)),
        "b_hh_l0": u(keys[3], (H4,)),
        "w_ih_l1": u(keys[4], (H4, hidden_size)),
        "w_hh_l1": u(keys[5], (H4, hidden_size)),
        "b_ih_l1": u(keys[6], (H4,)),
        "b_hh_l1": u(keys[7], (H4,)),
        "w_fc":    u(keys[8], (output_size, hidden_size)),
        "b_fc":    u(keys[9], (output_size,)),
    }


def lstm_forward(x, params):
    """x: (B, T, I) float32  ->  (B, O) float32"""
    B, T, I = x.shape
    H = HIDDEN_SIZE
    O = params["w_fc"].shape[0]
    O_pad = max(128, ((O + 127) // 128) * 128)   # lane-dense FC output slab

    # Time-major, flattened to (T*B, I): lets the kernel do the layer-0 input
    # projection as one batched matmul. MXU operands in bf16, f32 accumulate.
    x2d = jnp.transpose(x, (1, 0, 2)).reshape(T * B, I).astype(jnp.bfloat16)

    wih0 = params["w_ih_l0"].T.astype(jnp.bfloat16)                        # (I, 4H)
    whh0 = params["w_hh_l0"].T.astype(jnp.bfloat16)                        # (H, 4H)
    b0 = (params["b_ih_l0"] + params["b_hh_l0"]).reshape(1, 4 * H).astype(jnp.float32)
    # Layer 1: stack [W_ih_l1; W_hh_l1] so concat([h0, h1]) needs one matmul.
    w1 = jnp.concatenate(
        [params["w_ih_l1"].T, params["w_hh_l1"].T], axis=0).astype(jnp.bfloat16)  # (2H, 4H)
    b1 = (params["b_ih_l1"] + params["b_hh_l1"]).reshape(1, 4 * H).astype(jnp.float32)
    # FC head padded to 128 output lanes for an unmasked store.
    wfc = jnp.zeros((H, O_pad), jnp.bfloat16).at[:, :O].set(
        params["w_fc"].T.astype(jnp.bfloat16))
    bfc = jnp.zeros((1, O_pad), jnp.float32).at[0, :O].set(params["b_fc"])

    ins = (x2d, wih0, whh0, b0, w1, b1, wfc, bfc)
    vmem = pl.BlockSpec(memory_space=pltpu.MemorySpace.VMEM)
    # NOTE: at these sizes everything fits comfortably in VMEM with no grid.
    # If B grows, add a grid over the batch dim with dimension_semantics=
    # ("parallel",) to use both v7x TensorCores; if T grows, stream x in chunks.
    out_padded = pl.pallas_call(
        _lstm_kernel,
        out_shape=jax.ShapeDtypeStruct((B, O_pad), jnp.float32),
        in_specs=[vmem] * len(ins),
        out_specs=vmem,
    )(*ins)
    return out_padded[:, :O]


if __name__ == "__main__":
    key = jax.random.PRNGKey(0)
    pkey, xkey = jax.random.split(key)

    B, T, I, O = 2, 8, 4, 1          # batch, seq, input_size, output_size
    params = init_params(pkey, I, HIDDEN_SIZE, O)
    x = jax.random.normal(xkey, (B, T, I), jnp.float32)

    out = lstm_forward(x, params)
    jax.block_until_ready(out)
    assert out.shape == (B, O)
    assert bool(jnp.all(jnp.isfinite(out)))
    print("KERNEL_OK")
</pallas_src>

<mosaic_0001>
module attributes {stable_mosaic.version = 11 : i64} {
  func.func @_lstm_kernel(%arg0: memref<16x4xbf16, #tpu.memory_space<vmem>>, %arg1: memref<4x128xbf16, #tpu.memory_space<vmem>>, %arg2: memref<32x128xbf16, #tpu.memory_space<vmem>>, %arg3: memref<1x128xf32, #tpu.memory_space<vmem>>, %arg4: memref<64x128xbf16, #tpu.memory_space<vmem>>, %arg5: memref<1x128xf32, #tpu.memory_space<vmem>>, %arg6: memref<32x128xbf16, #tpu.memory_space<vmem>>, %arg7: memref<1x128xf32, #tpu.memory_space<vmem>>, %arg8: memref<2x128xf32, #tpu.memory_space<vmem>>) attributes {dimension_semantics = [], scalar_prefetch = 0 : i64, scratch_operands = 0 : i64, tpu.core_type = #tpu.core_type<tc>} {
    %c0 = arith.constant 0 : index
    %c0_0 = arith.constant 0 : index
    %0 = vector.load %arg2[%c0, %c0_0] : memref<32x128xbf16, #tpu.memory_space<vmem>>, vector<32x128xbf16>
    %c0_1 = arith.constant 0 : index
    %c0_2 = arith.constant 0 : index
    %1 = vector.load %arg4[%c0_1, %c0_2] : memref<64x128xbf16, #tpu.memory_space<vmem>>, vector<64x128xbf16>
    %c0_3 = arith.constant 0 : index
    %c0_4 = arith.constant 0 : index
    %2 = vector.load %arg0[%c0_3, %c0_4] : memref<16x4xbf16, #tpu.memory_space<vmem>>, vector<16x4xbf16>
    %c0_5 = arith.constant 0 : index
    %c0_6 = arith.constant 0 : index
    %3 = vector.load %arg1[%c0_5, %c0_6] : memref<4x128xbf16, #tpu.memory_space<vmem>>, vector<4x128xbf16>
    %cst = arith.constant dense<0.000000e+00> : vector<16x128xf32>
    %4 = tpu.matmul %2, %3, %cst {dimension_numbers = #tpu.dot_dimension_numbers<[1], [0], [0], [1], [0, 0, 1, 1], [], []>} : vector<16x4xbf16>, vector<4x128xbf16>, vector<16x128xf32> -> vector<16x128xf32>
    %c0_7 = arith.constant 0 : index
    %c0_8 = arith.constant 0 : index
    %5 = vector.load %arg3[%c0_7, %c0_8] : memref<1x128xf32, #tpu.memory_space<vmem>>, vector<1x128xf32>
    %6 = vector.broadcast %5 : vector<1x128xf32> to vector<16x128xf32>
    %7 = arith.addf %4, %6 : vector<16x128xf32>
    %c0_9 = arith.constant 0 : index
    %c0_10 = arith.constant 0 : index
    %8 = vector.load %arg5[%c0_9, %c0_10] : memref<1x128xf32, #tpu.memory_space<vmem>>, vector<1x128xf32>
    %9 = vector.shape_cast %8 : vector<1x128xf32> to vector<1x128xf32>
    %10 = vector.broadcast %9 : vector<1x128xf32> to vector<2x128xf32>
    %cst_11 = arith.constant 0.000000e+00 : f32
    %11 = vector.broadcast %cst_11 : f32 to vector<2x32xf32>
    %12 = vector.extract_strided_slice %7 {offsets = [0, 0], sizes = [2, 128], strides = [1, 1]} : vector<16x128xf32> to vector<2x128xf32>
    %13 = arith.truncf %11 : vector<2x32xf32> to vector<2x32xbf16>
    %cst_12 = arith.constant dense<0.000000e+00> : vector<2x128xf32>
    %14 = tpu.matmul %13, %0, %cst_12 {dimension_numbers = #tpu.dot_dimension_numbers<[1], [0], [0], [1], [0, 0, 1, 1], [], []>} : vector<2x32xbf16>, vector<32x128xbf16>, vector<2x128xf32> -> vector<2x128xf32>
    %15 = arith.addf %12, %14 : vector<2x128xf32>
    %16 = arith.negf %15 : vector<2x128xf32>
    %17 = math.exp %16 : vector<2x128xf32>
    %cst_13 = arith.constant 1.000000e+00 : f32
    %18 = vector.broadcast %cst_13 : f32 to vector<2x128xf32>
    %19 = arith.addf %18, %17 : vector<2x128xf32>
    %20 = arith.divf %18, %19 : vector<2x128xf32>
    %21 = math.tanh %15 : vector<2x128xf32>
    %22 = vector.extract_strided_slice %20 {offsets = [0, 0], sizes = [2, 32], strides = [1, 1]} : vector<2x128xf32> to vector<2x32xf32>
    %23 = vector.extract_strided_slice %20 {offsets = [0, 32], sizes = [2, 32], strides = [1, 1]} : vector<2x128xf32> to vector<2x32xf32>
    %24 = vector.extract_strided_slice %21 {offsets = [0, 64], sizes = [2, 32], strides = [1, 1]} : vector<2x128xf32> to vector<2x32xf32>
    %25 = vector.extract_strided_slice %20 {offsets = [0, 96], sizes = [2, 32], strides = [1, 1]} : vector<2x128xf32> to vector<2x32xf32>
    %26 = arith.mulf %23, %11 : vector<2x32xf32>
    %27 = arith.mulf %22, %24 : vector<2x32xf32>
    %28 = arith.addf %26, %27 : vector<2x32xf32>
    %29 = math.tanh %28 : vector<2x32xf32>
    %30 = arith.mulf %25, %29 : vector<2x32xf32>
    %31 = arith.truncf %30 : vector<2x32xf32> to vector<2x32xbf16>
    %32 = arith.truncf %11 : vector<2x32xf32> to vector<2x32xbf16>
    %33 = tpu.concatenate %31, %32 in 1 : vector<2x32xbf16>, vector<2x32xbf16> -> vector<2x64xbf16>
    %cst_14 = arith.constant dense<0.000000e+00> : vector<2x128xf32>
    %34 = tpu.matmul %33, %1, %cst_14 {dimension_numbers = #tpu.dot_dimension_numbers<[1], [0], [0], [1], [0, 0, 1, 1], [], []>} : vector<2x64xbf16>, vector<64x128xbf16>, vector<2x128xf32> -> vector<2x128xf32>
    %35 = arith.addf %34, %10 : vector<2x128xf32>
    %36 = arith.negf %35 : vector<2x128xf32>
    %37 = math.exp %36 : vector<2x128xf32>
    %cst_15 = arith.constant 1.000000e+00 : f32
    %38 = vector.broadcast %cst_15 : f32 to vector<2x128xf32>
    %39 = arith.addf %38, %37 : vector<2x128xf32>
    %40 = arith.divf %38, %39 : vector<2x128xf32>
    %41 = math.tanh %35 : vector<2x128xf32>
    %42 = vector.extract_strided_slice %40 {offsets = [0, 0], sizes = [2, 32], strides = [1, 1]} : vector<2x128xf32> to vector<2x32xf32>
    %43 = vector.extract_strided_slice %40 {offsets = [0, 32], sizes = [2, 32], strides = [1, 1]} : vector<2x128xf32> to vector<2x32xf32>
    %44 = vector.extract_strided_slice %41 {offsets = [0, 64], sizes = [2, 32], strides = [1, 1]} : vector<2x128xf32> to vector<2x32xf32>
    %45 = vector.extract_strided_slice %40 {offsets = [0, 96], sizes = [2, 32], strides = [1, 1]} : vector<2x128xf32> to vector<2x32xf32>
    %46 = arith.mulf %43, %11 : vector<2x32xf32>
    %47 = arith.mulf %42, %44 : vector<2x32xf32>
    %48 = arith.addf %46, %47 : vector<2x32xf32>
    %49 = math.tanh %48 : vector<2x32xf32>
    %50 = arith.mulf %45, %49 : vector<2x32xf32>
    %51 = vector.extract_strided_slice %7 {offsets = [2, 0], sizes = [2, 128], strides = [1, 1]} : vector<16x128xf32> to vector<2x128xf32>
    %52 = arith.truncf %30 : vector<2x32xf32> to vector<2x32xbf16>
    %cst_16 = arith.constant dense<0.000000e+00> : vector<2x128xf32>
    %53 = tpu.matmul %52, %0, %cst_16 {dimension_numbers = #tpu.dot_dimension_numbers<[1], [0], [0], [1], [0, 0, 1, 1], [], []>} : vector<2x32xbf16>, vector<32x128xbf16>, vector<2x128xf32> -> vector<2x128xf32>
    %54 = arith.addf %51, %53 : vector<2x128xf32>
    %55 = arith.negf %54 : vector<2x128xf32>
    %56 = math.exp %55 : vector<2x128xf32>
    %cst_17 = arith.constant 1.000000e+00 : f32
    %57 = vector.broadcast %cst_17 : f32 to vector<2x128xf32>
    %58 = arith.addf %57, %56 : vector<2x128xf32>
    %59 = arith.divf %57, %58 : vector<2x128xf32>
    %60 = math.tanh %54 : vector<2x128xf32>
    %61 = vector.extract_strided_slice %59 {offsets = [0, 0], sizes = [2, 32], strides = [1, 1]} : vector<2x128xf32> to vector<2x32xf32>
    %62 = vector.extract_strided_slice %59 {offsets = [0, 32], sizes = [2, 32], strides = [1, 1]} : vector<2x128xf32> to vector<2x32xf32>
    %63 = vector.extract_strided_slice %60 {offsets = [0, 64], sizes = [2, 32], strides = [1, 1]} : vector<2x128xf32> to vector<2x32xf32>
    %64 = vector.extract_strided_slice %59 {offsets = [0, 96], sizes = [2, 32], strides = [1, 1]} : vector<2x128xf32> to vector<2x32xf32>
    %65 = arith.mulf %62, %28 : vector<2x32xf32>
    %66 = arith.mulf %61, %63 : vector<2x32xf32>
    %67 = arith.addf %65, %66 : vector<2x32xf32>
    %68 = math.tanh %67 : vector<2x32xf32>
    %69 = arith.mulf %64, %68 : vector<2x32xf32>
    %70 = arith.truncf %69 : vector<2x32xf32> to vector<2x32xbf16>
    %71 = arith.truncf %50 : vector<2x32xf32> to vector<2x32xbf16>
    %72 = tpu.concatenate %70, %71 in 1 : vector<2x32xbf16>, vector<2x32xbf16> -> vector<2x64xbf16>
    %cst_18 = arith.constant dense<0.000000e+00> : vector<2x128xf32>
    %73 = tpu.matmul %72, %1, %cst_18 {dimension_numbers = #tpu.dot_dimension_numbers<[1], [0], [0], [1], [0, 0, 1, 1], [], []>} : vector<2x64xbf16>, vector<64x128xbf16>, vector<2x128xf32> -> vector<2x128xf32>
    %74 = arith.addf %73, %10 : vector<2x128xf32>
    %75 = arith.negf %74 : vector<2x128xf32>
    %76 = math.exp %75 : vector<2x128xf32>
    %cst_19 = arith.constant 1.000000e+00 : f32
    %77 = vector.broadcast %cst_19 : f32 to vector<2x128xf32>
    %78 = arith.addf %77, %76 : vector<2x128xf32>
    %79 = arith.divf %77, %78 : vector<2x128xf32>
    %80 = math.tanh %74 : vector<2x128xf32>
    %81 = vector.extract_strided_slice %79 {offsets = [0, 0], sizes = [2, 32], strides = [1, 1]} : vector<2x128xf32> to vector<2x32xf32>
    %82 = vector.extract_strided_slice %79 {offsets = [0, 32], sizes = [2, 32], strides = [1, 1]} : vector<2x128xf32> to vector<2x32xf32>
    %83 = vector.extract_strided_slice %80 {offsets = [0, 64], sizes = [2, 32], strides = [1, 1]} : vector<2x128xf32> to vector<2x32xf32>
    %84 = vector.extract_strided_slice %79 {offsets = [0, 96], sizes = [2, 32], strides = [1, 1]} : vector<2x128xf32> to vector<2x32xf32>
    %85 = arith.mulf %82, %48 : vector<2x32xf32>
    %86 = arith.mulf %81, %83 : vector<2x32xf32>
    %87 = arith.addf %85, %86 : vector<2x32xf32>
    %88 = math.tanh %87 : vector<2x32xf32>
    %89 = arith.mulf %84, %88 : vector<2x32xf32>
    %90 = vector.extract_strided_slice %7 {offsets = [4, 0], sizes = [2, 128], strides = [1, 1]} : vector<16x128xf32> to vector<2x128xf32>
    %91 = arith.truncf %69 : vector<2x32xf32> to vector<2x32xbf16>
    %cst_20 = arith.constant dense<0.000000e+00> : vector<2x128xf32>
    %92 = tpu.matmul %91, %0, %cst_20 {dimension_numbers = #tpu.dot_dimension_numbers<[1], [0], [0], [1], [0, 0, 1, 1], [], []>} : vector<2x32xbf16>, vector<32x128xbf16>, vector<2x128xf32> -> vector<2x128xf32>
    %93 = arith.addf %90, %92 : vector<2x128xf32>
    %94 = arith.negf %93 : vector<2x128xf32>
    %95 = math.exp %94 : vector<2x128xf32>
    %cst_21 = arith.constant 1.000000e+00 : f32
    %96 = vector.broadcast %cst_21 : f32 to vector<2x128xf32>
    %97 = arith.addf %96, %95 : vector<2x128xf32>
    %98 = arith.divf %96, %97 : vector<2x128xf32>
    %99 = math.tanh %93 : vector<2x128xf32>
    %100 = vector.extract_strided_slice %98 {offsets = [0, 0], sizes = [2, 32], strides = [1, 1]} : vector<2x128xf32> to vector<2x32xf32>
    %101 = vector.extract_strided_slice %98 {offsets = [0, 32], sizes = [2, 32], strides = [1, 1]} : vector<2x128xf32> to vector<2x32xf32>
    %102 = vector.extract_strided_slice %99 {offsets = [0, 64], sizes = [2, 32], strides = [1, 1]} : vector<2x128xf32> to vector<2x32xf32>
    %103 = vector.extract_strided_slice %98 {offsets = [0, 96], sizes = [2, 32], strides = [1, 1]} : vector<2x128xf32> to vector<2x32xf32>
    %104 = arith.mulf %101, %67 : vector<2x32xf32>
    %105 = arith.mulf %100, %102 : vector<2x32xf32>
    %106 = arith.addf %104, %105 : vector<2x32xf32>
    %107 = math.tanh %106 : vector<2x32xf32>
    %108 = arith.mulf %103, %107 : vector<2x32xf32>
    %109 = arith.truncf %108 : vector<2x32xf32> to vector<2x32xbf16>
    %110 = arith.truncf %89 : vector<2x32xf32> to vector<2x32xbf16>
    %111 = tpu.concatenate %109, %110 in 1 : vector<2x32xbf16>, vector<2x32xbf16> -> vector<2x64xbf16>
    %cst_22 = arith.constant dense<0.000000e+00> : vector<2x128xf32>
    %112 = tpu.matmul %111, %1, %cst_22 {dimension_numbers = #tpu.dot_dimension_numbers<[1], [0], [0], [1], [0, 0, 1, 1], [], []>} : vector<2x64xbf16>, vector<64x128xbf16>, vector<2x128xf32> -> vector<2x128xf32>
    %113 = arith.addf %112, %10 : vector<2x128xf32>
    %114 = arith.negf %113 : vector<2x128xf32>
    %115 = math.exp %114 : vector<2x128xf32>
    %cst_23 = arith.constant 1.000000e+00 : f32
    %116 = vector.broadcast %cst_23 : f32 to vector<2x128xf32>
    %117 = arith.addf %116, %115 : vector<2x128xf32>
    %118 = arith.divf %116, %117 : vector<2x128xf32>
    %119 = math.tanh %113 : vector<2x128xf32>
    %120 = vector.extract_strided_slice %118 {offsets = [0, 0], sizes = [2, 32], strides = [1, 1]} : vector<2x128xf32> to vector<2x32xf32>
    %121 = vector.extract_strided_slice %118 {offsets = [0, 32], sizes = [2, 32], strides = [1, 1]} : vector<2x128xf32> to vector<2x32xf32>
    %122 = vector.extract_strided_slice %119 {offsets = [0, 64], sizes = [2, 32], strides = [1, 1]} : vector<2x128xf32> to vector<2x32xf32>
    %123 = vector.extract_strided_slice %118 {offsets = [0, 96], sizes = [2, 32], strides = [1, 1]} : vector<2x128xf32> to vector<2x32xf32>
    %124 = arith.mulf %121, %87 : vector<2x32xf32>
    %125 = arith.mulf %120, %122 : vector<2x32xf32>
    %126 = arith.addf %124, %125 : vector<2x32xf32>
    %127 = math.tanh %126 : vector<2x32xf32>
    %128 = arith.mulf %123, %127 : vector<2x32xf32>
    %129 = vector.extract_strided_slice %7 {offsets = [6, 0], sizes = [2, 128], strides = [1, 1]} : vector<16x128xf32> to vector<2x128xf32>
    %130 = arith.truncf %108 : vector<2x32xf32> to vector<2x32xbf16>
    %cst_24 = arith.constant dense<0.000000e+00> : vector<2x128xf32>
    %131 = tpu.matmul %130, %0, %cst_24 {dimension_numbers = #tpu.dot_dimension_numbers<[1], [0], [0], [1], [0, 0, 1, 1], [], []>} : vector<2x32xbf16>, vector<32x128xbf16>, vector<2x128xf32> -> vector<2x128xf32>
    %132 = arith.addf %129, %131 : vector<2x128xf32>
    %133 = arith.negf %132 : vector<2x128xf32>
    %134 = math.exp %133 : vector<2x128xf32>
    %cst_25 = arith.constant 1.000000e+00 : f32
    %135 = vector.broadcast %cst_25 : f32 to vector<2x128xf32>
    %136 = arith.addf %135, %134 : vector<2x128xf32>
    %137 = arith.divf %135, %136 : vector<2x128xf32>
    %138 = math.tanh %132 : vector<2x128xf32>
    %139 = vector.extract_strided_slice %137 {offsets = [0, 0], sizes = [2, 32], strides = [1, 1]} : vector<2x128xf32> to vector<2x32xf32>
    %140 = vector.extract_strided_slice %137 {offsets = [0, 32], sizes = [2, 32], strides = [1, 1]} : vector<2x128xf32> to vector<2x32xf32>
    %141 = vector.extract_strided_slice %138 {offsets = [0, 64], sizes = [2, 32], strides = [1, 1]} : vector<2x128xf32> to vector<2x32xf32>
    %142 = vector.extract_strided_slice %137 {offsets = [0, 96], sizes = [2, 32], strides = [1, 1]} : vector<2x128xf32> to vector<2x32xf32>
    %143 = arith.mulf %140, %106 : vector<2x32xf32>
    %144 = arith.mulf %139, %141 : vector<2x32xf32>
    %145 = arith.addf %143, %144 : vector<2x32xf32>
    %146 = math.tanh %145 : vector<2x32xf32>
    %147 = arith.mulf %142, %146 : vector<2x32xf32>
    %148 = arith.truncf %147 : vector<2x32xf32> to vector<2x32xbf16>
    %149 = arith.truncf %128 : vector<2x32xf32> to vector<2x32xbf16>
    %150 = tpu.concatenate %148, %149 in 1 : vector<2x32xbf16>, vector<2x32xbf16> -> vector<2x64xbf16>
    %cst_26 = arith.constant dense<0.000000e+00> : vector<2x128xf32>
    %151 = tpu.matmul %150, %1, %cst_26 {dimension_numbers = #tpu.dot_dimension_numbers<[1], [0], [0], [1], [0, 0, 1, 1], [], []>} : vector<2x64xbf16>, vector<64x128xbf16>, vector<2x128xf32> -> vector<2x128xf32>
    %152 = arith.addf %151, %10 : vector<2x128xf32>
    %153 = arith.negf %152 : vector<2x128xf32>
    %154 = math.exp %153 : vector<2x128xf32>
    %cst_27 = arith.constant 1.000000e+00 : f32
    %155 = vector.broadcast %cst_27 : f32 to vector<2x128xf32>
    %156 = arith.addf %155, %154 : vector<2x128xf32>
    %157 = arith.divf %155, %156 : vector<2x128xf32>
    %158 = math.tanh %152 : vector<2x128xf32>
    %159 = vector.extract_strided_slice %157 {offsets = [0, 0], sizes = [2, 32], strides = [1, 1]} : vector<2x128xf32> to vector<2x32xf32>
    %160 = vector.extract_strided_slice %157 {offsets = [0, 32], sizes = [2, 32], strides = [1, 1]} : vector<2x128xf32> to vector<2x32xf32>
    %161 = vector.extract_strided_slice %158 {offsets = [0, 64], sizes = [2, 32], strides = [1, 1]} : vector<2x128xf32> to vector<2x32xf32>
    %162 = vector.extract_strided_slice %157 {offsets = [0, 96], sizes = [2, 32], strides = [1, 1]} : vector<2x128xf32> to vector<2x32xf32>
    %163 = arith.mulf %160, %126 : vector<2x32xf32>
    %164 = arith.mulf %159, %161 : vector<2x32xf32>
    %165 = arith.addf %163, %164 : vector<2x32xf32>
    %166 = math.tanh %165 : vector<2x32xf32>
    %167 = arith.mulf %162, %166 : vector<2x32xf32>
    %168 = vector.extract_strided_slice %7 {offsets = [8, 0], sizes = [2, 128], strides = [1, 1]} : vector<16x128xf32> to vector<2x128xf32>
    %169 = arith.truncf %147 : vector<2x32xf32> to vector<2x32xbf16>
    %cst_28 = arith.constant dense<0.000000e+00> : vector<2x128xf32>
    %170 = tpu.matmul %169, %0, %cst_28 {dimension_numbers = #tpu.dot_dimension_numbers<[1], [0], [0], [1], [0, 0, 1, 1], [], []>} : vector<2x32xbf16>, vector<32x128xbf16>, vector<2x128xf32> -> vector<2x128xf32>
    %171 = arith.addf %168, %170 : vector<2x128xf32>
    %172 = arith.negf %171 : vector<2x128xf32>
    %173 = math.exp %172 : vector<2x128xf32>
    %cst_29 = arith.constant 1.000000e+00 : f32
    %174 = vector.broadcast %cst_29 : f32 to vector<2x128xf32>
    %175 = arith.addf %174, %173 : vector<2x128xf32>
    %176 = arith.divf %174, %175 : vector<2x128xf32>
    %177 = math.tanh %171 : vector<2x128xf32>
    %178 = vector.extract_strided_slice %176 {offsets = [0, 0], sizes = [2, 32], strides = [1, 1]} : vector<2x128xf32> to vector<2x32xf32>
    %179 = vector.extract_strided_slice %176 {offsets = [0, 32], sizes = [2, 32], strides = [1, 1]} : vector<2x128xf32> to vector<2x32xf32>
    %180 = vector.extract_strided_slice %177 {offsets = [0, 64], sizes = [2, 32], strides = [1, 1]} : vector<2x128xf32> to vector<2x32xf32>
    %181 = vector.extract_strided_slice %176 {offsets = [0, 96], sizes = [2, 32], strides = [1, 1]} : vector<2x128xf32> to vector<2x32xf32>
    %182 = arith.mulf %179, %145 : vector<2x32xf32>
    %183 = arith.mulf %178, %180 : vector<2x32xf32>
    %184 = arith.addf %182, %183 : vector<2x32xf32>
    %185 = math.tanh %184 : vector<2x32xf32>
    %186 = arith.mulf %181, %185 : vector<2x32xf32>
    %187 = arith.truncf %186 : vector<2x32xf32> to vector<2x32xbf16>
    %188 = arith.truncf %167 : vector<2x32xf32> to vector<2x32xbf16>
    %189 = tpu.concatenate %187, %188 in 1 : vector<2x32xbf16>, vector<2x32xbf16> -> vector<2x64xbf16>
    %cst_30 = arith.constant dense<0.000000e+00> : vector<2x128xf32>
    %190 = tpu.matmul %189, %1, %cst_30 {dimension_numbers = #tpu.dot_dimension_numbers<[1], [0], [0], [1], [0, 0, 1, 1], [], []>} : vector<2x64xbf16>, vector<64x128xbf16>, vector<2x128xf32> -> vector<2x128xf32>
    %191 = arith.addf %190, %10 : vector<2x128xf32>
    %192 = arith.negf %191 : vector<2x128xf32>
    %193 = math.exp %192 : vector<2x128xf32>
    %cst_31 = arith.constant 1.000000e+00 : f32
    %194 = vector.broadcast %cst_31 : f32 to vector<2x128xf32>
    %195 = arith.addf %194, %193 : vector<2x128xf32>
    %196 = arith.divf %194, %195 : vector<2x128xf32>
    %197 = math.tanh %191 : vector<2x128xf32>
    %198 = vector.extract_strided_slice %196 {offsets = [0, 0], sizes = [2, 32], strides = [1, 1]} : vector<2x128xf32> to vector<2x32xf32>
    %199 = vector.extract_strided_slice %196 {offsets = [0, 32], sizes = [2, 32], strides = [1, 1]} : vector<2x128xf32> to vector<2x32xf32>
    %200 = vector.extract_strided_slice %197 {offsets = [0, 64], sizes = [2, 32], strides = [1, 1]} : vector<2x128xf32> to vector<2x32xf32>
    %201 = vector.extract_strided_slice %196 {offsets = [0, 96], sizes = [2, 32], strides = [1, 1]} : vector<2x128xf32> to vector<2x32xf32>
    %202 = arith.mulf %199, %165 : vector<2x32xf32>
    %203 = arith.mulf %198, %200 : vector<2x32xf32>
    %204 = arith.addf %202, %203 : vector<2x32xf32>
    %205 = math.tanh %204 : vector<2x32xf32>
    %206 = arith.mulf %201, %205 : vector<2x32xf32>
    %207 = vector.extract_strided_slice %7 {offsets = [10, 0], sizes = [2, 128], strides = [1, 1]} : vector<16x128xf32> to vector<2x128xf32>
    %208 = arith.truncf %186 : vector<2x32xf32> to vector<2x32xbf16>
    %cst_32 = arith.constant dense<0.000000e+00> : vector<2x128xf32>
    %209 = tpu.matmul %208, %0, %cst_32 {dimension_numbers = #tpu.dot_dimension_numbers<[1], [0], [0], [1], [0, 0, 1, 1], [], []>} : vector<2x32xbf16>, vector<32x128xbf16>, vector<2x128xf32> -> vector<2x128xf32>
    %210 = arith.addf %207, %209 : vector<2x128xf32>
    %211 = arith.negf %210 : vector<2x128xf32>
    %212 = math.exp %211 : vector<2x128xf32>
    %cst_33 = arith.constant 1.000000e+00 : f32
    %213 = vector.broadcast %cst_33 : f32 to vector<2x128xf32>
    %214 = arith.addf %213, %212 : vector<2x128xf32>
    %215 = arith.divf %213, %214 : vector<2x128xf32>
    %216 = math.tanh %210 : vector<2x128xf32>
    %217 = vector.extract_strided_slice %215 {offsets = [0, 0], sizes = [2, 32], strides = [1, 1]} : vector<2x128xf32> to vector<2x32xf32>
    %218 = vector.extract_strided_slice %215 {offsets = [0, 32], sizes = [2, 32], strides = [1, 1]} : vector<2x128xf32> to vector<2x32xf32>
    %219 = vector.extract_strided_slice %216 {offsets = [0, 64], sizes = [2, 32], strides = [1, 1]} : vector<2x128xf32> to vector<2x32xf32>
    %220 = vector.extract_strided_slice %215 {offsets = [0, 96], sizes = [2, 32], strides = [1, 1]} : vector<2x128xf32> to vector<2x32xf32>
    %221 = arith.mulf %218, %184 : vector<2x32xf32>
    %222 = arith.mulf %217, %219 : vector<2x32xf32>
    %223 = arith.addf %221, %222 : vector<2x32xf32>
    %224 = math.tanh %223 : vector<2x32xf32>
    %225 = arith.mulf %220, %224 : vector<2x32xf32>
    %226 = arith.truncf %225 : vector<2x32xf32> to vector<2x32xbf16>
    %227 = arith.truncf %206 : vector<2x32xf32> to vector<2x32xbf16>
    %228 = tpu.concatenate %226, %227 in 1 : vector<2x32xbf16>, vector<2x32xbf16> -> vector<2x64xbf16>
    %cst_34 = arith.constant dense<0.000000e+00> : vector<2x128xf32>
    %229 = tpu.matmul %228, %1, %cst_34 {dimension_numbers = #tpu.dot_dimension_numbers<[1], [0], [0], [1], [0, 0, 1, 1], [], []>} : vector<2x64xbf16>, vector<64x128xbf16>, vector<2x128xf32> -> vector<2x128xf32>
    %230 = arith.addf %229, %10 : vector<2x128xf32>
    %231 = arith.negf %230 : vector<2x128xf32>
    %232 = math.exp %231 : vector<2x128xf32>
    %cst_35 = arith.constant 1.000000e+00 : f32
    %233 = vector.broadcast %cst_35 : f32 to vector<2x128xf32>
    %234 = arith.addf %233, %232 : vector<2x128xf32>
    %235 = arith.divf %233, %234 : vector<2x128xf32>
    %236 = math.tanh %230 : vector<2x128xf32>
    %237 = vector.extract_strided_slice %235 {offsets = [0, 0], sizes = [2, 32], strides = [1, 1]} : vector<2x128xf32> to vector<2x32xf32>
    %238 = vector.extract_strided_slice %235 {offsets = [0, 32], sizes = [2, 32], strides = [1, 1]} : vector<2x128xf32> to vector<2x32xf32>
    %239 = vector.extract_strided_slice %236 {offsets = [0, 64], sizes = [2, 32], strides = [1, 1]} : vector<2x128xf32> to vector<2x32xf32>
    %240 = vector.extract_strided_slice %235 {offsets = [0, 96], sizes = [2, 32], strides = [1, 1]} : vector<2x128xf32> to vector<2x32xf32>
    %241 = arith.mulf %238, %204 : vector<2x32xf32>
    %242 = arith.mulf %237, %239 : vector<2x32xf32>
    %243 = arith.addf %241, %242 : vector<2x32xf32>
    %244 = math.tanh %243 : vector<2x32xf32>
    %245 = arith.mulf %240, %244 : vector<2x32xf32>
    %246 = vector.extract_strided_slice %7 {offsets = [12, 0], sizes = [2, 128], strides = [1, 1]} : vector<16x128xf32> to vector<2x128xf32>
    %247 = arith.truncf %225 : vector<2x32xf32> to vector<2x32xbf16>
    %cst_36 = arith.constant dense<0.000000e+00> : vector<2x128xf32>
    %248 = tpu.matmul %247, %0, %cst_36 {dimension_numbers = #tpu.dot_dimension_numbers<[1], [0], [0], [1], [0, 0, 1, 1], [], []>} : vector<2x32xbf16>, vector<32x128xbf16>, vector<2x128xf32> -> vector<2x128xf32>
    %249 = arith.addf %246, %248 : vector<2x128xf32>
    %250 = arith.negf %249 : vector<2x128xf32>
    %251 = math.exp %250 : vector<2x128xf32>
    %cst_37 = arith.constant 1.000000e+00 : f32
    %252 = vector.broadcast %cst_37 : f32 to vector<2x128xf32>
    %253 = arith.addf %252, %251 : vector<2x128xf32>
    %254 = arith.divf %252, %253 : vector<2x128xf32>
    %255 = math.tanh %249 : vector<2x128xf32>
    %256 = vector.extract_strided_slice %254 {offsets = [0, 0], sizes = [2, 32], strides = [1, 1]} : vector<2x128xf32> to vector<2x32xf32>
    %257 = vector.extract_strided_slice %254 {offsets = [0, 32], sizes = [2, 32], strides = [1, 1]} : vector<2x128xf32> to vector<2x32xf32>
    %258 = vector.extract_strided_slice %255 {offsets = [0, 64], sizes = [2, 32], strides = [1, 1]} : vector<2x128xf32> to vector<2x32xf32>
    %259 = vector.extract_strided_slice %254 {offsets = [0, 96], sizes = [2, 32], strides = [1, 1]} : vector<2x128xf32> to vector<2x32xf32>
    %260 = arith.mulf %257, %223 : vector<2x32xf32>
    %261 = arith.mulf %256, %258 : vector<2x32xf32>
    %262 = arith.addf %260, %261 : vector<2x32xf32>
    %263 = math.tanh %262 : vector<2x32xf32>
    %264 = arith.mulf %259, %263 : vector<2x32xf32>
    %265 = arith.truncf %264 : vector<2x32xf32> to vector<2x32xbf16>
    %266 = arith.truncf %245 : vector<2x32xf32> to vector<2x32xbf16>
    %267 = tpu.concatenate %265, %266 in 1 : vector<2x32xbf16>, vector<2x32xbf16> -> vector<2x64xbf16>
    %cst_38 = arith.constant dense<0.000000e+00> : vector<2x128xf32>
    %268 = tpu.matmul %267, %1, %cst_38 {dimension_numbers = #tpu.dot_dimension_numbers<[1], [0], [0], [1], [0, 0, 1, 1], [], []>} : vector<2x64xbf16>, vector<64x128xbf16>, vector<2x128xf32> -> vector<2x128xf32>
    %269 = arith.addf %268, %10 : vector<2x128xf32>
    %270 = arith.negf %269 : vector<2x128xf32>
    %271 = math.exp %270 : vector<2x128xf32>
    %cst_39 = arith.constant 1.000000e+00 : f32
    %272 = vector.broadcast %cst_39 : f32 to vector<2x128xf32>
    %273 = arith.addf %272, %271 : vector<2x128xf32>
    %274 = arith.divf %272, %273 : vector<2x128xf32>
    %275 = math.tanh %269 : vector<2x128xf32>
    %276 = vector.extract_strided_slice %274 {offsets = [0, 0], sizes = [2, 32], strides = [1, 1]} : vector<2x128xf32> to vector<2x32xf32>
    %277 = vector.extract_strided_slice %274 {offsets = [0, 32], sizes = [2, 32], strides = [1, 1]} : vector<2x128xf32> to vector<2x32xf32>
    %278 = vector.extract_strided_slice %275 {offsets = [0, 64], sizes = [2, 32], strides = [1, 1]} : vector<2x128xf32> to vector<2x32xf32>
    %279 = vector.extract_strided_slice %274 {offsets = [0, 96], sizes = [2, 32], strides = [1, 1]} : vector<2x128xf32> to vector<2x32xf32>
    %280 = arith.mulf %277, %243 : vector<2x32xf32>
    %281 = arith.mulf %276, %278 : vector<2x32xf32>
    %282 = arith.addf %280, %281 : vector<2x32xf32>
    %283 = math.tanh %282 : vector<2x32xf32>
    %284 = arith.mulf %279, %283 : vector<2x32xf32>
    %285 = vector.extract_strided_slice %7 {offsets = [14, 0], sizes = [2, 128], strides = [1, 1]} : vector<16x128xf32> to vector<2x128xf32>
    %286 = arith.truncf %264 : vector<2x32xf32> to vector<2x32xbf16>
    %cst_40 = arith.constant dense<0.000000e+00> : vector<2x128xf32>
    %287 = tpu.matmul %286, %0, %cst_40 {dimension_numbers = #tpu.dot_dimension_numbers<[1], [0], [0], [1], [0, 0, 1, 1], [], []>} : vector<2x32xbf16>, vector<32x128xbf16>, vector<2x128xf32> -> vector<2x128xf32>
    %288 = arith.addf %285, %287 : vector<2x128xf32>
    %289 = arith.negf %288 : vector<2x128xf32>
    %290 = math.exp %289 : vector<2x128xf32>
    %cst_41 = arith.constant 1.000000e+00 : f32
    %291 = vector.broadcast %cst_41 : f32 to vector<2x128xf32>
    %292 = arith.addf %291, %290 : vector<2x128xf32>
    %293 = arith.divf %291, %292 : vector<2x128xf32>
    %294 = math.tanh %288 : vector<2x128xf32>
    %295 = vector.extract_strided_slice %293 {offsets = [0, 0], sizes = [2, 32], strides = [1, 1]} : vector<2x128xf32> to vector<2x32xf32>
    %296 = vector.extract_strided_slice %293 {offsets = [0, 32], sizes = [2, 32], strides = [1, 1]} : vector<2x128xf32> to vector<2x32xf32>
    %297 = vector.extract_strided_slice %294 {offsets = [0, 64], sizes = [2, 32], strides = [1, 1]} : vector<2x128xf32> to vector<2x32xf32>
    %298 = vector.extract_strided_slice %293 {offsets = [0, 96], sizes = [2, 32], strides = [1, 1]} : vector<2x128xf32> to vector<2x32xf32>
    %299 = arith.mulf %296, %262 : vector<2x32xf32>
    %300 = arith.mulf %295, %297 : vector<2x32xf32>
    %301 = arith.addf %299, %300 : vector<2x32xf32>
    %302 = math.tanh %301 : vector<2x32xf32>
    %303 = arith.mulf %298, %302 : vector<2x32xf32>
    %304 = arith.truncf %303 : vector<2x32xf32> to vector<2x32xbf16>
    %305 = arith.truncf %284 : vector<2x32xf32> to vector<2x32xbf16>
    %306 = tpu.concatenate %304, %305 in 1 : vector<2x32xbf16>, vector<2x32xbf16> -> vector<2x64xbf16>
    %cst_42 = arith.constant dense<0.000000e+00> : vector<2x128xf32>
    %307 = tpu.matmul %306, %1, %cst_42 {dimension_numbers = #tpu.dot_dimension_numbers<[1], [0], [0], [1], [0, 0, 1, 1], [], []>} : vector<2x64xbf16>, vector<64x128xbf16>, vector<2x128xf32> -> vector<2x128xf32>
    %308 = arith.addf %307, %10 : vector<2x128xf32>
    %309 = arith.negf %308 : vector<2x128xf32>
    %310 = math.exp %309 : vector<2x128xf32>
    %cst_43 = arith.constant 1.000000e+00 : f32
    %311 = vector.broadcast %cst_43 : f32 to vector<2x128xf32>
    %312 = arith.addf %311, %310 : vector<2x128xf32>
    %313 = arith.divf %311, %312 : vector<2x128xf32>
    %314 = math.tanh %308 : vector<2x128xf32>
    %315 = vector.extract_strided_slice %313 {offsets = [0, 0], sizes = [2, 32], strides = [1, 1]} : vector<2x128xf32> to vector<2x32xf32>
    %316 = vector.extract_strided_slice %313 {offsets = [0, 32], sizes = [2, 32], strides = [1, 1]} : vector<2x128xf32> to vector<2x32xf32>
    %317 = vector.extract_strided_slice %314 {offsets = [0, 64], sizes = [2, 32], strides = [1, 1]} : vector<2x128xf32> to vector<2x32xf32>
    %318 = vector.extract_strided_slice %313 {offsets = [0, 96], sizes = [2, 32], strides = [1, 1]} : vector<2x128xf32> to vector<2x32xf32>
    %319 = arith.mulf %316, %282 : vector<2x32xf32>
    %320 = arith.mulf %315, %317 : vector<2x32xf32>
    %321 = arith.addf %319, %320 : vector<2x32xf32>
    %322 = math.tanh %321 : vector<2x32xf32>
    %323 = arith.mulf %318, %322 : vector<2x32xf32>
    %324 = arith.truncf %323 : vector<2x32xf32> to vector<2x32xbf16>
    %c0_44 = arith.constant 0 : index
    %c0_45 = arith.constant 0 : index
    %325 = vector.load %arg6[%c0_44, %c0_45] : memref<32x128xbf16, #tpu.memory_space<vmem>>, vector<32x128xbf16>
    %cst_46 = arith.constant dense<0.000000e+00> : vector<2x128xf32>
    %326 = tpu.matmul %324, %325, %cst_46 {dimension_numbers = #tpu.dot_dimension_numbers<[1], [0], [0], [1], [0, 0, 1, 1], [], []>} : vector<2x32xbf16>, vector<32x128xbf16>, vector<2x128xf32> -> vector<2x128xf32>
    %c0_47 = arith.constant 0 : index
    %c0_48 = arith.constant 0 : index
    %327 = vector.load %arg7[%c0_47, %c0_48] : memref<1x128xf32, #tpu.memory_space<vmem>>, vector<1x128xf32>
    %328 = vector.broadcast %327 : vector<1x128xf32> to vector<2x128xf32>
    %329 = arith.addf %326, %328 : vector<2x128xf32>
    %c0_49 = arith.constant 0 : index
    %c0_50 = arith.constant 0 : index
    %330 = vector.load %arg8[%c0_49, %c0_50] : memref<2x128xf32, #tpu.memory_space<vmem>>, vector<2x128xf32>
    tpu.vector_store %arg8[%c0_49, %c0_50], %329 {strides = array<i32>} : memref<2x128xf32, #tpu.memory_space<vmem>>, vector<2x128xf32>,
    return
  }
}

</mosaic_0001>

<bundles_post_ra>
// kernel: tpu_custom_call.1
= control target key start
LH: loop header
LB: loop body
LE: loop exit
PB: predicated region body
PF: predicated region fallthrough
CT: control target
= control target key end

     0   :  { %13 = vsyncpa [#allocation3], 0  ;;  %s2403_s0 = inlined_call_operand.vmem [shape: bf16[16,4], index: 0, kind: input, shape index: {}]   ;;  %s2404_s1 = inlined_call_operand.vmem [shape: bf16[4,128], index: 1, kind: input, shape index: {}]   ;;  %s2405_s2 = inlined_call_operand.hbm [shape: bf16[32,128], index: 2, kind: input, shape index: {}]   ;;  %s2406_s3 = inlined_call_operand.vmem [shape: f32[1,128], index: 3, kind: input, shape index: {}]   ;;  %s2407_s4 = inlined_call_operand.hbm [shape: bf16[64,128], index: 4, kind: input, shape index: {}]   ;;  %s2408_s5 = inlined_call_operand.vmem [shape: f32[1,128], index: 5, kind: input, shape index: {}]   ;;  %s2409_s6 = inlined_call_operand.vmem [shape: bf16[32,128], index: 6, kind: input, shape index: {}]   ;;  %s2410_s7 = inlined_call_operand.vmem [shape: f32[1,128], index: 7, kind: input, shape index: {}]   ;;  %s2411_s8 = inlined_call_operand.hbm [shape: f32[2,128], index: 8, kind: output, shape index: {}]  }
   0x1   :  { %14 = vsyncpa [#allocation6], 0 }
   0x2   :  { %15 = vsyncpa [#allocation4], 0  ;;  %s1999_s27 = smov [#allocation2]  }
   0x3   :  { %s25_s28 = sshll.u32 %s1999_s27, 4  ;;  %s26_s28 = int_to_ptr.vmem [resolvable:$true] %s25_s28 }
   0x4   :  { %s1941_s29 = scalar_lea.vmem %s26_s28, 256  ;;  %p1946_p1 = scmp.lt.s32.totalorder %s26_s28, %s26_s28 }
   0x5   :  { %p1942_p0 = scmp.ne.s32.totalorder %s26_s28, %s1941_s29  ;;  %p1947_p2 = scmp.lt.s32.totalorder %s1941_s29, %s1941_s29 }
   0x7   :  { %p1948_p3 = por %p1947_p2, %p1946_p1 }
   0x9   :  { %p1949_p4 = pnand %p1948_p3, %p1942_p0 }
   0xb   :  { %1952 = shalt.err (!%p1949_p4)
}
   0xc   :  { %s2000_s30 = smov 64   ;;  %s2001_s9 = smov 4  }
   0xd   :  { %31 = dma.hbm_to_vmem [thread:$0]  %s2405_s2, 256, %s26_s28, [#allocation3], %s2000_s30, %s2000_s30, %s2001_s9  }
   0xe   :  { %s2002_s12 = smov [#allocation5]  }
   0xf   :  { %s39_s13 = sshll.u32 %s2002_s12, 4  ;;  %s40_s13 = int_to_ptr.vmem [resolvable:$true] %s39_s13 }
  0x10   :  { %s1961_s14 = scalar_lea.vmem %s40_s13, 512  ;;  %p1966_p6 = scmp.lt.s32.totalorder %s40_s13, %s40_s13 }
  0x11   :  { %p1962_p5 = scmp.ne.s32.totalorder %s40_s13, %s1961_s14  ;;  %p1967_p7 = scmp.lt.s32.totalorder %s1961_s14, %s1961_s14 }
  0x13   :  { %p1968_p8 = por %p1967_p7, %p1966_p6 }
  0x15   :  { %p1969_p9 = pnand %p1968_p8, %p1962_p5 }
  0x17   :  { %1972 = shalt.err (!%p1969_p9)
}
  0x18   :  { %45 = dma.hbm_to_vmem [thread:$0]  %s2407_s4, 512, %s40_s13, [#allocation6], %s2000_s30, %s2000_s30, %s2001_s9  }
  0x19   :  { %1993 = dma.done.wait [#allocation3], 256  }
  0x1a   :  { %1994 = vsyncadd [#allocation3], 4294967040 }
  0x1b   :  { %1995 = dma.done.wait [#allocation6], 512  }
  0x1c   :  { %1996 = vsyncadd [#allocation6], 4294966784  ;;  %v2003_v0 = vmov 0.0   ;;  %vm2004_vm0 = vmmov 0   ;;  %vm90_vm1 = vcmask 1041408   ;;  %v2072_v3 = vld [vmem:[#allocation2 + $0x8] sm:$0xff]  }
  0x1d   :  { %1612 = vmatprep.subr.bf16.mxu0 %v2003_v0  ;;  %1618 = vmatprep.subr.bf16.mxu1 %v2003_v0  ;;  %v73_v1 = vld [vmem:[%s2404_s1] sm:$0x3]  ;;  %vm86_vm2 = vcmask 31744   ;;  %v2005_v6 = vmov 0   ;;  %v2105_v29 = vld [vmem:[#allocation5 + $0x18] sm:$0xff]   ;;  %v2112_v31 = vld [vmem:[#allocation5 + $0x8] sm:$0xff]  }
  0x1e   :  { %1614 = vmatprep.mubr.msk.bf16.mxu0 %vm2004_vm0, %v2003_v0  ;;  %1622 = vmatprep.mubr.msk.bf16.mxu1 %vm2004_vm0, %v2003_v0  ;;  %v92_v2 = vsel %vm90_vm1, %v73_v1, 0  ;;  %v1796_v4 = vld [vmem:[%s2403_s0] sm:$0xff]   ;;  %v2117_v33 = vld [vmem:[#allocation5] sm:$0xff]   ;;  %vm154_vm3 = vcmask 261120   ;;  %vm253_vm4 = vcmask 523264   ;;  %s2007_s28 = smov [#allocation7]  }
  0x1f   :  { %1613 = vmatpush3.bf16.msra.mxu0 %v92_v2  ;;  %1619 = vmatpush3.bf16.msra.mxu1 %v2072_v3  ;;  %v2078_v5 = vld [vmem:[#allocation2] sm:$0xff]  }
  0x20   :  { %1626 = vmatprep.subr.bf16.mxu0 %v2003_v0  ;;  %1620 = vmatprep.subr.bf16.mxu1 %v2003_v0  ;;  %v1498_v7 = vld [vmem:[%s2406_s3] ss:$0 sm:$0xff]  ;;  %s2006_s3 = smov 32  }
  0x21   :  { %v2108_v30 = vld [vmem:[#allocation5 + $0x10] sm:$0xff]  }
  0x22   :  { %1615 = vmatmul.mubr.msk.bf16.vlgmr.msra.gmra.mxu0 %vm86_vm2, %v1796_v4  ;;  %v2145_v39 = vld [vmem:[%s2408_s5] ss:$0 sm:$0xff] }
  0x23   :  { %1634 = vmatprep.mubr.msk.bf16.mxu0 %vm2004_vm0, %v2003_v0  ;;  %1621 = vmatpush3.bf16.msra.mxu1 %v2078_v5 }
  0x24   :  { %1638 = vmatprep.subr.bf16.mxu1 %v2003_v0  ;;  %1627 = vmatpush3.bf16.msra.mxu0 %v2105_v29 }
  0x25   :  { %1628 = vmatprep.subr.bf16.mxu0 %v2003_v0 }
  0x26   :  { %1623 = vmatmul.mubr.bf16.vlgmr.msra.gmra.mxu1 %v2005_v6 }
  0x27   :  { %1639 = vmatpush3.bf16.msra.mxu1 %v2072_v3  ;;  %1642 = vmatprep.mubr.msk.bf16.mxu1 %vm2004_vm0, %v2003_v0 }
  0x28   :  { %1640 = vmatprep.subr.bf16.mxu1 %v2003_v0  ;;  %1629 = vmatpush3.bf16.msra.mxu0 %v2108_v30 }
  0x29   :  { %1630 = vmatprep.subr.bf16.mxu0 %v2003_v0 }
  0x2b   :  { %1641 = vmatpush3.bf16.msra.mxu1 %v2078_v5 }
  0x2c   :  { %1646 = vmatprep.subr.bf16.mxu1 %v2003_v0  ;;  %1631 = vmatpush3.bf16.msra.mxu0 %v2112_v31 }
  0x2d   :  { %1632 = vmatprep.subr.bf16.mxu0 %v2003_v0 }
  0x30   :  { %1633 = vmatpush3.bf16.msra.mxu0 %v2117_v33 }
  0x31   :  { %1658 = vmatprep.subr.bf16.mxu0 %v2003_v0 }
  0xe2   :  { %v128_v8 = vpop.f32.mrf.mxu0 }
  0xe3   :  { %v2095_v9 = vadd.f32 %v1498_v7, %v128_v8 }
  0xe4   :  { %v1616_v10 = vpop.f32.mrf.mxu0 }
  0xe6   :  { %v131_v11 = vpop.f32.mrf.mxu0  ;;  %v192_v13 = vpop.f32.mrf.mxu1 }
  0xe7   :  { %v2097_v12 = vadd.f32 %v1498_v7, %v131_v11  ;;  %v198_v14 = vadd.f32 %v192_v13, %v2095_v9 }
  0xe8   :  { %v1617_v15 = vpop.f32.mrf.mxu0  ;;  %v1624_v16 = vpop.f32.mrf.mxu1 }
  0xe9   :  { %1804 = vtanh.f32 %v198_v14  ;;  %v1504_v20 = vmul.f32 -1.442695, %v198_v14 }
  0xea   :  { %v195_v17 = vpop.f32.mrf.mxu1 }
  0xeb   :  { %1806 = vpow2.f32 %v1504_v20 }
  0xec   :  { %v1625_v18 = vpop.f32.mrf.mxu1 }
  0xf6   :  { %v1805_v19 = vpop.eup %1804 }
  0xf7   :  { %208 = vrot.lane.b32.xlu0 %v1805_v19, %s2000_s30 }
  0xf8   :  { %v1807_v21 = vpop.eup %1806 }
  0xf9   :  { %v202_v22 = vadd.f32 1.0, %v1807_v21 }
  0xfb   :  { %1808 = vrcp.f32 %v202_v22 }
 0x108   :  { %v1809_v23 = vpop.eup %1808 }
 0x109   :  { %v206_v26 = vmul.f32 0.0, %v1809_v23 }
 0x169   :  { %v209_v24 = vpop.permute.xlu0 %208 }
 0x16a   :  { %v211_v25 = vmul.f32 %v1809_v23, %v209_v24 }
 0x16c   :  { %213 = vrot.lane.b32.xlu0 %v211_v25, %s2006_s3 }
 0x1de   :  { %v214_v27 = vpop.permute.xlu0 %213 }
 0x1df   :  { %v2102_v28 = vadd.f32 %v214_v27, %v206_v26 }
 0x1e1   :  { %1810 = vtanh.f32 %v2102_v28  ;;  %v374_v2 = vrot.slane %v2102_v28, 6 }
 0x1ee   :  { %v1811_v32 = vpop.eup %1810 }
 0x1ef   :  { %219 = vrot.lane.b32.xlu1 %v1811_v32, %s2000_s30 }
 0x261   :  { %v220_v34 = vpop.permute.xlu1 %219 }
 0x262   :  { %v222_v35 = vmul.f32 %v1809_v23, %v220_v34 }
 0x264   :  { %v223_v36 = vpack.c.bf16 %v222_v35, %v222_v35 }
 0x266   :  { %225 = vrot.lane.b32.xlu1 %v223_v36, %s2006_s3 }
 0x2d8   :  { %v226_v37 = vpop.permute.xlu1 %225 }
 0x2d9   :  { %v228_v38 = vsel %vm154_vm3, %v226_v37, 0  ;;  %1643 = vmatmul.mubr.msk.bf16.vlgmr.msra.gmra.mxu1 %vm154_vm3, %v226_v37 }
 0x2da   :  { %1635 = vmatmul.mubr.msk.bf16.vlgmr.msra.gmra.mxu0 %vm253_vm4, %v228_v38  ;;  %1647 = vmatpush3.bf16.msra.mxu1 %v2105_v29 }
 0x2db   :  { %1648 = vmatprep.subr.bf16.mxu1 %v2003_v0  ;;  %1659 = vmatpush3.bf16.msra.mxu0 %v2072_v3 }
 0x2dc   :  { %1660 = vmatprep.subr.bf16.mxu0 %v2003_v0  ;;  %1654 = vmatprep.mubr.msk.bf16.mxu1 %vm2004_vm0, %v2003_v0 }
 0x2dd   :  { %1662 = vmatprep.mubr.msk.bf16.mxu0 %vm2004_vm0, %v2003_v0 }
 0x2de   :  { %1649 = vmatpush3.bf16.msra.mxu1 %v2108_v30 }
 0x2df   :  { %1650 = vmatprep.subr.bf16.mxu1 %v2003_v0  ;;  %1661 = vmatpush3.bf16.msra.mxu0 %v2078_v5 }
 0x2e0   :  { %1666 = vmatprep.subr.bf16.mxu0 %v2003_v0 }
 0x2e2   :  { %1651 = vmatpush3.bf16.msra.mxu1 %v2112_v31 }
 0x2e3   :  { %1652 = vmatprep.subr.bf16.mxu1 %v2003_v0 }
 0x2e6   :  { %1653 = vmatpush3.bf16.msra.mxu1 %v2117_v33 }
 0x2e7   :  { %1678 = vmatprep.subr.bf16.mxu1 %v2003_v0 }
 0x399   :  { %v356_v40 = vpop.f32.mrf.mxu1 }
 0x39a   :  { %v363_v41 = vrot.slane %v356_v40, 6  ;;  %v290_v42 = vpop.f32.mrf.mxu0 }
 0x39b   :  { %v291_v43 = vadd.f32 %v2145_v39, %v290_v42  ;;  %v1644_v44 = vpop.f32.mrf.mxu1 }
 0x39c   :  { %v365_v45 = vadd.f32 %v363_v41, %v2095_v9  ;;  %v1636_v46 = vpop.f32.mrf.mxu0 }
 0x39d   :  { %1812 = vtanh.f32 %v291_v43  ;;  %v359_v47 = vpop.f32.mrf.mxu1  ;;  %v1510_v53 = vmul.f32 -1.442695, %v291_v43 }
 0x39e   :  { %1814 = vtanh.f32 %v365_v45  ;;  %v293_v48 = vpop.f32.mrf.mxu0  ;;  %v1512_v54 = vmul.f32 -1.442695, %v365_v45 }
 0x39f   :  { %v1645_v49 = vpop.f32.mrf.mxu1  ;;  %1816 = vpow2.f32 %v1510_v53 }
 0x3a0   :  { %v1637_v50 = vpop.f32.mrf.mxu0  ;;  %1818 = vpow2.f32 %v1512_v54 }
 0x3aa   :  { %v1813_v51 = vpop.eup %1812 }
 0x3ab   :  { %v1815_v52 = vpop.eup %1814  ;;  %305 = vrot.lane.b32.xlu0 %v1813_v51, %s2000_s30 }
 0x3ac   :  { %378 = vrot.lane.b32.xlu1 %v1815_v52, %s2000_s30  ;;  %v1817_v55 = vpop.eup %1816 }
 0x3ad   :  { %v1819_v56 = vpop.eup %1818  ;;  %v299_v57 = vadd.f32 1.0, %v1817_v55 }
 0x3ae   :  { %v369_v58 = vadd.f32 1.0, %v1819_v56 }
 0x3af   :  { %1820 = vrcp.f32 %v299_v57 }
 0x3b0   :  { %1822 = vrcp.f32 %v369_v58 }
 0x3bc   :  { %v1821_v59 = vpop.eup %1820 }
 0x3bd   :  { %v1823_v61 = vpop.eup %1822  ;;  %v303_v4 = vmul.f32 0.0, %v1821_v59 }
 0x3be   :  { %v376_v7 = vmul.f32 %v1823_v61, %v374_v2 }
 0x41d   :  { %v306_v60 = vpop.permute.xlu0 %305 }
 0x41e   :  { %v308_v62 = vmul.f32 %v1821_v59, %v306_v60  ;;  %v379_v63 = vpop.permute.xlu1 %378 }
 0x41f   :  { %v381_v1 = vmul.f32 %v1823_v61, %v379_v63 }
 0x420   :  { %310 = vrot.lane.b32.xlu0 %v308_v62, %s2006_s3 }
 0x421   :  { %383 = vrot.lane.b32.xlu1 %v381_v1, %s2006_s3 }
 0x492   :  { %v311_v6 = vpop.permute.xlu0 %310 }
 0x493   :  { %v2154_v8 = vadd.f32 %v311_v6, %v303_v4  ;;  %v384_v10 = vpop.permute.xlu1 %383 }
 0x494   :  { %v2156_v11 = vadd.f32 %v384_v10, %v376_v7 }
 0x495   :  { %1824 = vtanh.f32 %v2154_v8 }
 0x496   :  { %1826 = vtanh.f32 %v2156_v11 }
 0x4a2   :  { %v1825_v13 = vpop.eup %1824 }
 0x4a3   :  { %v1827_v14 = vpop.eup %1826  ;;  %316 = vrot.lane.b32.xlu0 %v1825_v13, %s2000_s30 }
 0x4a4   :  { %389 = vrot.lane.b32.xlu1 %v1827_v14, %s2000_s30 }
 0x515   :  { %v317_v15 = vpop.permute.xlu0 %316 }
 0x516   :  { %v319_v16 = vmul.f32 %v1821_v59, %v317_v15  ;;  %v390_v17 = vpop.permute.xlu1 %389  ;;  %v532_v59 = vrot.slane %v2156_v11, 6 }
 0x517   :  { %v392_v18 = vmul.f32 %v1823_v61, %v390_v17 }
 0x518   :  { %v394_v19 = vpack.c.bf16 %v319_v16, %v319_v16 }
 0x519   :  { %v393_v20 = vpack.c.bf16 %v392_v18, %v392_v18 }
 0x51a   :  { %v399_v21 = vrot.slane %v394_v19, 7 }
 0x51b   :  { %396 = vrot.lane.b32.xlu0 %v393_v20, %s2006_s3  ;;  %v474_v22 = vrot.slane %v393_v20, 1 }
 0x51c   :  { %400 = vrot.lane.b32.xlu1 %v399_v21, %s2000_s30 }
 0x51f   :  { %475 = vrot.lane.b32.xlu0 %v474_v22, %s2006_s3 }
 0x58d   :  { %v397_v23 = vpop.permute.xlu0 %396 }
 0x58e   :  { %v401_v24 = vpop.permute.xlu1 %400 }
 0x58f   :  { %v404_v25 = vsel %vm154_vm3, %v397_v23, %v401_v24 }
 0x590   :  { %v406_v26 = vrot.slane %v404_v25, 1 }
 0x591   :  { %v476_v27 = vpop.permute.xlu0 %475 }
 0x592   :  { %1655 = vmatmul.mubr.msk.bf16.vlgmr.msra.gmra.mxu1 %vm253_vm4, %v406_v26  ;;  %1663 = vmatmul.mubr.msk.bf16.vlgmr.msra.gmra.mxu0 %vm154_vm3, %v476_v27 }
 0x593   :  { %1667 = vmatpush3.bf16.msra.mxu0 %v2105_v29  ;;  %1679 = vmatpush3.bf16.msra.mxu1 %v2072_v3 }
 0x594   :  { %1668 = vmatprep.subr.bf16.mxu0 %v2003_v0  ;;  %1680 = vmatprep.subr.bf16.mxu1 %v2003_v0 }
 0x595   :  { %1674 = vmatprep.mubr.msk.bf16.mxu0 %vm2004_vm0, %v2003_v0  ;;  %1682 = vmatprep.mubr.msk.bf16.mxu1 %vm2004_vm0, %v2003_v0 }
 0x597   :  { %1669 = vmatpush3.bf16.msra.mxu0 %v2108_v30  ;;  %1681 = vmatpush3.bf16.msra.mxu1 %v2078_v5 }
 0x598   :  { %1670 = vmatprep.subr.bf16.mxu0 %v2003_v0  ;;  %1686 = vmatprep.subr.bf16.mxu1 %v2003_v0 }
 0x59b   :  { %1671 = vmatpush3.bf16.msra.mxu0 %v2112_v31 }
 0x59c   :  { %1672 = vmatprep.subr.bf16.mxu0 %v2003_v0 }
 0x59f   :  { %1673 = vmatpush3.bf16.msra.mxu0 %v2117_v33 }
 0x5a0   :  { %1698 = vmatprep.subr.bf16.mxu0 %v2003_v0 }
 0x652   :  { %v444_v28 = vpop.f32.mrf.mxu1  ;;  %v514_v32 = vpop.f32.mrf.mxu0 }
 0x653   :  { %v445_v34 = vadd.f32 %v2145_v39, %v444_v28  ;;  %v521_v35 = vrot.slane %v514_v32, 4 }
 0x654   :  { %v1656_v36 = vpop.f32.mrf.mxu1  ;;  %v1664_v37 = vpop.f32.mrf.mxu0 }
 0x655   :  { %1828 = vtanh.f32 %v445_v34  ;;  %v523_v38 = vadd.f32 %v521_v35, %v2095_v9  ;;  %v1514_v46 = vmul.f32 -1.442695, %v445_v34 }
 0x656   :  { %v447_v40 = vpop.f32.mrf.mxu1  ;;  %v517_v41 = vpop.f32.mrf.mxu0 }
 0x657   :  { %1830 = vtanh.f32 %v523_v38  ;;  %v1516_v47 = vmul.f32 -1.442695, %v523_v38 }
 0x658   :  { %v1657_v42 = vpop.f32.mrf.mxu1  ;;  %v1665_v43 = vpop.f32.mrf.mxu0  ;;  %1832 = vpow2.f32 %v1514_v46 }
 0x659   :  { %1834 = vpow2.f32 %v1516_v47 }
 0x662   :  { %v1829_v44 = vpop.eup %1828 }
 0x663   :  { %459 = vrot.lane.b32.xlu1 %v1829_v44, %s2000_s30 }
 0x664   :  { %v1831_v45 = vpop.eup %1830 }
 0x665   :  { %536 = vrot.lane.b32.xlu0 %v1831_v45, %s2000_s30  ;;  %v1833_v48 = vpop.eup %1832 }
 0x666   :  { %v1835_v49 = vpop.eup %1834  ;;  %v453_v50 = vadd.f32 1.0, %v1833_v48 }
 0x667   :  { %v527_v51 = vadd.f32 1.0, %v1835_v49 }
 0x668   :  { %1836 = vrcp.f32 %v453_v50 }
 0x669   :  { %1838 = vrcp.f32 %v527_v51 }
 0x675   :  { %v1837_v52 = vpop.eup %1836 }
 0x676   :  { %v1839_v55 = vpop.eup %1838  ;;  %v457_v58 = vmul.f32 %v1837_v52, %v2154_v8 }
 0x677   :  { %v534_v62 = vmul.f32 %v1839_v55, %v532_v59 }
 0x6d5   :  { %v460_v53 = vpop.permute.xlu1 %459 }
 0x6d6   :  { %v462_v54 = vmul.f32 %v1837_v52, %v460_v53 }
 0x6d7   :  { %v537_v56 = vpop.permute.xlu0 %536 }
 0x6d8   :  { %464 = vrot.lane.b32.xlu1 %v462_v54, %s2006_s3  ;;  %v539_v57 = vmul.f32 %v1839_v55, %v537_v56 }
 0x6da   :  { %541 = vrot.lane.b32.xlu0 %v539_v57, %s2006_s3 }
 0x74a   :  { %v465_v60 = vpop.permute.xlu1 %464 }
 0x74b   :  { %v2192_v61 = vadd.f32 %v465_v60, %v457_v58 }
 0x74c   :  { %v542_v63 = vpop.permute.xlu0 %541 }
 0x74d   :  { %1840 = vtanh.f32 %v2192_v61  ;;  %v2195_v1 = vadd.f32 %v542_v63, %v534_v62 }
 0x74f   :  { %1842 = vtanh.f32 %v2195_v1  ;;  %v690_v51 = vrot.slane %v2195_v1, 6 }
 0x75a   :  { %v1841_v2 = vpop.eup %1840 }
 0x75b   :  { %470 = vrot.lane.b32.xlu1 %v1841_v2, %s2000_s30 }
 0x75c   :  { %v1843_v4 = vpop.eup %1842 }
 0x75d   :  { %547 = vrot.lane.b32.xlu0 %v1843_v4, %s2000_s30 }
 0x7cd   :  { %v471_v6 = vpop.permute.xlu1 %470 }
 0x7ce   :  { %v473_v7 = vmul.f32 %v1837_v52, %v471_v6 }
 0x7cf   :  { %v548_v10 = vpop.permute.xlu0 %547 }
 0x7d0   :  { %v552_v8 = vpack.c.bf16 %v473_v7, %v473_v7  ;;  %v550_v11 = vmul.f32 %v1839_v55, %v548_v10 }
 0x7d2   :  { %v557_v13 = vrot.slane %v552_v8, 6  ;;  %v551_v14 = vpack.c.bf16 %v550_v11, %v550_v11 }
 0x7d4   :  { %558 = vrot.lane.b32.xlu0 %v557_v13, %s2000_s30  ;;  %554 = vrot.lane.b32.xlu1 %v551_v14, %s2006_s3  ;;  %v632_v15 = vrot.slane %v551_v14, 2 }
 0x7d8   :  { %633 = vrot.lane.b32.xlu1 %v632_v15, %s2006_s3 }
 0x846   :  { %v559_v16 = vpop.permute.xlu0 %558  ;;  %v555_v17 = vpop.permute.xlu1 %554 }
 0x847   :  { %v562_v18 = vsel %vm154_vm3, %v555_v17, %v559_v16 }
 0x848   :  { %v564_v19 = vrot.slane %v562_v18, 2 }
 0x84a   :  { %1675 = vmatmul.mubr.msk.bf16.vlgmr.msra.gmra.mxu0 %vm253_vm4, %v564_v19  ;;  %v634_v20 = vpop.permute.xlu1 %633 }
 0x84b   :  { %1683 = vmatmul.mubr.msk.bf16.vlgmr.msra.gmra.mxu1 %vm154_vm3, %v634_v20  ;;  %1699 = vmatpush3.bf16.msra.mxu0 %v2072_v3 }
 0x84c   :  { %1687 = vmatpush3.bf16.msra.mxu1 %v2105_v29  ;;  %1700 = vmatprep.subr.bf16.mxu0 %v2003_v0 }
 0x84d   :  { %1688 = vmatprep.subr.bf16.mxu1 %v2003_v0  ;;  %1694 = vmatprep.mubr.msk.bf16.mxu1 %vm2004_vm0, %v2003_v0 }
 0x84e   :  { %1702 = vmatprep.mubr.msk.bf16.mxu0 %vm2004_vm0, %v2003_v0 }
 0x84f   :  { %1701 = vmatpush3.bf16.msra.mxu0 %v2078_v5 }
 0x850   :  { %1689 = vmatpush3.bf16.msra.mxu1 %v2108_v30  ;;  %1706 = vmatprep.subr.bf16.mxu0 %v2003_v0 }
 0x851   :  { %1690 = vmatprep.subr.bf16.mxu1 %v2003_v0 }
 0x854   :  { %1691 = vmatpush3.bf16.msra.mxu1 %v2112_v31 }
 0x855   :  { %1692 = vmatprep.subr.bf16.mxu1 %v2003_v0 }
 0x858   :  { %1693 = vmatpush3.bf16.msra.mxu1 %v2117_v33 }
 0x859   :  { %1718 = vmatprep.subr.bf16.mxu1 %v2003_v0 }
 0x90a   :  { %v602_v21 = vpop.f32.mrf.mxu0 }
 0x90b   :  { %v603_v22 = vadd.f32 %v2145_v39, %v602_v21  ;;  %v672_v23 = vpop.f32.mrf.mxu1 }
 0x90c   :  { %v679_v24 = vrot.slane %v672_v23, 2  ;;  %v1676_v25 = vpop.f32.mrf.mxu0 }
 0x90d   :  { %1844 = vtanh.f32 %v603_v22  ;;  %v1684_v26 = vpop.f32.mrf.mxu1  ;;  %v1518_v38 = vmul.f32 -1.442695, %v603_v22 }
 0x90e   :  { %v681_v27 = vadd.f32 %v679_v24, %v2095_v9  ;;  %v605_v28 = vpop.f32.mrf.mxu0 }
 0x90f   :  { %v675_v32 = vpop.f32.mrf.mxu1 }
 0x910   :  { %1846 = vtanh.f32 %v681_v27  ;;  %v1677_v34 = vpop.f32.mrf.mxu0  ;;  %v1520_v40 = vmul.f32 -1.442695, %v681_v27 }
 0x911   :  { %v1685_v35 = vpop.f32.mrf.mxu1  ;;  %1848 = vpow2.f32 %v1518_v38 }
 0x912   :  { %1850 = vpow2.f32 %v1520_v40 }
 0x91a   :  { %v1845_v36 = vpop.eup %1844 }
 0x91b   :  { %617 = vrot.lane.b32.xlu0 %v1845_v36, %s2000_s30 }
 0x91d   :  { %v1847_v37 = vpop.eup %1846 }
 0x91e   :  { %694 = vrot.lane.b32.xlu1 %v1847_v37, %s2000_s30  ;;  %v1849_v41 = vpop.eup %1848 }
 0x91f   :  { %v1851_v42 = vpop.eup %1850  ;;  %v611_v43 = vadd.f32 1.0, %v1849_v41 }
 0x920   :  { %v685_v44 = vadd.f32 1.0, %v1851_v42 }
 0x921   :  { %1852 = vrcp.f32 %v611_v43 }
 0x922   :  { %1854 = vrcp.f32 %v685_v44 }
 0x92e   :  { %v1853_v9 = vpop.eup %1852 }
 0x92f   :  { %v1855_v47 = vpop.eup %1854  ;;  %v615_v50 = vmul.f32 %v1853_v9, %v2192_v61 }
 0x930   :  { %v692_v54 = vmul.f32 %v1855_v47, %v690_v51 }
 0x98d   :  { %v618_v45 = vpop.permute.xlu0 %617 }
 0x98e   :  { %v620_v46 = vmul.f32 %v1853_v9, %v618_v45 }
 0x990   :  { %622 = vrot.lane.b32.xlu0 %v620_v46, %s2006_s3  ;;  %v695_v48 = vpop.permute.xlu1 %694 }
 0x991   :  { %v697_v49 = vmul.f32 %v1855_v47, %v695_v48 }
 0x993   :  { %699 = vrot.lane.b32.xlu1 %v697_v49, %s2006_s3 }
 0xa02   :  { %v623_v52 = vpop.permute.xlu0 %622 }
 0xa03   :  { %v2230_v53 = vadd.f32 %v623_v52, %v615_v50 }
 0xa05   :  { %1856 = vtanh.f32 %v2230_v53  ;;  %v700_v55 = vpop.permute.xlu1 %699 }
 0xa06   :  { %v2233_v56 = vadd.f32 %v700_v55, %v692_v54 }
 0xa08   :  { %1858 = vtanh.f32 %v2233_v56  ;;  %v845_v42 = vrot.slane %v2233_v56, 6 }
 0xa12   :  { %v1857_v57 = vpop.eup %1856 }
 0xa13   :  { %628 = vrot.lane.b32.xlu0 %v1857_v57, %s2000_s30 }
 0xa15   :  { %v1859_v58 = vpop.eup %1858 }
 0xa16   :  { %705 = vrot.lane.b32.xlu1 %v1859_v58, %s2000_s30 }
 0xa85   :  { %v629_v59 = vpop.permute.xlu0 %628 }
 0xa86   :  { %v631_v60 = vmul.f32 %v1853_v9, %v629_v59 }
 0xa88   :  { %v710_v61 = vpack.c.bf16 %v631_v60, %v631_v60  ;;  %v706_v62 = vpop.permute.xlu1 %705 }
 0xa89   :  { %v708_v63 = vmul.f32 %v1855_v47, %v706_v62 }
 0xa8a   :  { %v715_v1 = vrot.slane %v710_v61, 5 }
 0xa8b   :  { %v709_v2 = vpack.c.bf16 %v708_v63, %v708_v63 }
 0xa8c   :  { %716 = vrot.lane.b32.xlu1 %v715_v1, %s2000_s30 }
 0xa8d   :  { %712 = vrot.lane.b32.xlu0 %v709_v2, %s2006_s3  ;;  %v790_v4 = vrot.slane %v709_v2, 3 }
 0xa91   :  { %791 = vrot.lane.b32.xlu0 %v790_v4, %s2006_s3 }
 0xafe   :  { %v717_v6 = vpop.permute.xlu1 %716 }
 0xaff   :  { %v713_v7 = vpop.permute.xlu0 %712 }
 0xb00   :  { %v720_v8 = vsel %vm154_vm3, %v713_v7, %v717_v6 }
 0xb01   :  { %v722_v10 = vrot.slane %v720_v8, 3 }
 0xb03   :  { %v792_v11 = vpop.permute.xlu0 %791  ;;  %1695 = vmatmul.mubr.msk.bf16.vlgmr.msra.gmra.mxu1 %vm253_vm4, %v722_v10 }
 0xb04   :  { %1703 = vmatmul.mubr.msk.bf16.vlgmr.msra.gmra.mxu0 %vm154_vm3, %v792_v11  ;;  %1719 = vmatpush3.bf16.msra.mxu1 %v2072_v3 }
 0xb05   :  { %1707 = vmatpush3.bf16.msra.mxu0 %v2105_v29  ;;  %1720 = vmatprep.subr.bf16.mxu1 %v2003_v0 }
 0xb06   :  { %1708 = vmatprep.subr.bf16.mxu0 %v2003_v0  ;;  %1722 = vmatprep.mubr.msk.bf16.mxu1 %vm2004_vm0, %v2003_v0 }
 0xb07   :  { %1714 = vmatprep.mubr.msk.bf16.mxu0 %vm2004_vm0, %v2003_v0 }
 0xb08   :  { %1721 = vmatpush3.bf16.msra.mxu1 %v2078_v5 }
 0xb09   :  { %1709 = vmatpush3.bf16.msra.mxu0 %v2108_v30  ;;  %1726 = vmatprep.subr.bf16.mxu1 %v2003_v0 }
 0xb0a   :  { %1710 = vmatprep.subr.bf16.mxu0 %v2003_v0 }
 0xb0d   :  { %1711 = vmatpush3.bf16.msra.mxu0 %v2112_v31 }
 0xb0e   :  { %1712 = vmatprep.subr.bf16.mxu0 %v2003_v0 }
 0xb11   :  { %1713 = vmatpush3.bf16.msra.mxu0 %v2117_v33 }
 0xb12   :  { %1738 = vmatprep.subr.bf16.mxu0 %v2003_v0 }
 0xbc3   :  { %v760_v13 = vpop.f32.mrf.mxu1 }
 0xbc4   :  { %v761_v14 = vadd.f32 %v2145_v39, %v760_v13  ;;  %v830_v15 = vpop.f32.mrf.mxu0 }
 0xbc5   :  { %v836_v16 = vadd.f32 %v830_v15, %v2097_v12  ;;  %v1696_v17 = vpop.f32.mrf.mxu1 }
 0xbc6   :  { %1860 = vtanh.f32 %v761_v14  ;;  %v1704_v18 = vpop.f32.mrf.mxu0  ;;  %v1522_v25 = vmul.f32 -1.442695, %v761_v14 }
 0xbc7   :  { %1862 = vtanh.f32 %v836_v16  ;;  %v763_v19 = vpop.f32.mrf.mxu1  ;;  %v1524_v26 = vmul.f32 -1.442695, %v836_v16 }
 0xbc8   :  { %v833_v20 = vpop.f32.mrf.mxu0  ;;  %1864 = vpow2.f32 %v1522_v25 }
 0xbc9   :  { %v1697_v21 = vpop.f32.mrf.mxu1  ;;  %1866 = vpow2.f32 %v1524_v26 }
 0xbca   :  { %v1705_v22 = vpop.f32.mrf.mxu0 }
 0xbd3   :  { %v1861_v23 = vpop.eup %1860 }
 0xbd4   :  { %v1863_v24 = vpop.eup %1862  ;;  %775 = vrot.lane.b32.xlu1 %v1861_v23, %s2000_s30 }
 0xbd5   :  { %849 = vrot.lane.b32.xlu0 %v1863_v24, %s2000_s30  ;;  %v1865_v27 = vpop.eup %1864 }
 0xbd6   :  { %v1867_v28 = vpop.eup %1866  ;;  %v769_v32 = vadd.f32 1.0, %v1865_v27 }
 0xbd7   :  { %v840_v34 = vadd.f32 1.0, %v1867_v28 }
 0xbd8   :  { %1868 = vrcp.f32 %v769_v32 }
 0xbd9   :  { %1870 = vrcp.f32 %v840_v34 }
 0xbe5   :  { %v1869_v35 = vpop.eup %1868 }
 0xbe6   :  { %v1871_v37 = vpop.eup %1870  ;;  %v773_v43 = vmul.f32 %v1869_v35, %v2230_v53 }
 0xbe7   :  { %v847_v9 = vmul.f32 %v1871_v37, %v845_v42 }
 0xc46   :  { %v776_v36 = vpop.permute.xlu1 %775 }
 0xc47   :  { %v778_v38 = vmul.f32 %v1869_v35, %v776_v36  ;;  %v850_v40 = vpop.permute.xlu0 %849 }
 0xc48   :  { %v852_v41 = vmul.f32 %v1871_v37, %v850_v40 }
 0xc49   :  { %780 = vrot.lane.b32.xlu1 %v778_v38, %s2006_s3 }
 0xc4a   :  { %854 = vrot.lane.b32.xlu0 %v852_v41, %s2006_s3 }
 0xcbb   :  { %v781_v44 = vpop.permute.xlu1 %780 }
 0xcbc   :  { %v2268_v45 = vadd.f32 %v781_v44, %v773_v43  ;;  %v855_v46 = vpop.permute.xlu0 %854 }
 0xcbd   :  { %v2270_v47 = vadd.f32 %v855_v46, %v847_v9 }
 0xcbe   :  { %1872 = vtanh.f32 %v2268_v45 }
 0xcbf   :  { %1874 = vtanh.f32 %v2270_v47  ;;  %v995_v25 = vrot.slane %v2270_v47, 6 }
 0xccb   :  { %v1873_v48 = vpop.eup %1872 }
 0xccc   :  { %v1875_v49 = vpop.eup %1874  ;;  %786 = vrot.lane.b32.xlu1 %v1873_v48, %s2000_s30 }
 0xccd   :  { %860 = vrot.lane.b32.xlu0 %v1875_v49, %s2000_s30 }
 0xd3e   :  { %v787_v50 = vpop.permute.xlu1 %786 }
 0xd3f   :  { %v789_v51 = vmul.f32 %v1869_v35, %v787_v50  ;;  %v861_v52 = vpop.permute.xlu0 %860 }
 0xd40   :  { %v863_v53 = vmul.f32 %v1871_v37, %v861_v52 }
 0xd41   :  { %v865_v54 = vpack.c.bf16 %v789_v51, %v789_v51 }
 0xd42   :  { %v864_v55 = vpack.c.bf16 %v863_v53, %v863_v53 }
 0xd43   :  { %870 = vrot.lane.b32.xlu0 %v865_v54, %s2000_s30 }
 0xd44   :  { %867 = vrot.lane.b32.xlu1 %v864_v55, %s2006_s3 }
 0xdb5   :  { %v871_v56 = vpop.permute.xlu0 %870 }
 0xdb6   :  { %v868_v57 = vpop.permute.xlu1 %867 }
 0xdb7   :  { %v874_v58 = vsel %vm154_vm3, %v868_v57, %v871_v56  ;;  %1723 = vmatmul.mubr.msk.bf16.vlgmr.msra.gmra.mxu1 %vm154_vm3, %v868_v57 }
 0xdb8   :  { %1715 = vmatmul.mubr.msk.bf16.vlgmr.msra.gmra.mxu0 %vm253_vm4, %v874_v58  ;;  %1727 = vmatpush3.bf16.msra.mxu1 %v2105_v29 }
 0xdb9   :  { %1728 = vmatprep.subr.bf16.mxu1 %v2003_v0  ;;  %1739 = vmatpush3.bf16.msra.mxu0 %v2072_v3 }
 0xdba   :  { %1740 = vmatprep.subr.bf16.mxu0 %v2003_v0  ;;  %1734 = vmatprep.mubr.msk.bf16.mxu1 %vm2004_vm0, %v2003_v0 }
 0xdbb   :  { %1742 = vmatprep.mubr.msk.bf16.mxu0 %vm2004_vm0, %v2003_v0 }
 0xdbc   :  { %1729 = vmatpush3.bf16.msra.mxu1 %v2108_v30 }
 0xdbd   :  { %1730 = vmatprep.subr.bf16.mxu1 %v2003_v0  ;;  %1741 = vmatpush3.bf16.msra.mxu0 %v2078_v5 }
 0xdbe   :  { %1746 = vmatprep.subr.bf16.mxu0 %v2003_v0 }
 0xdc0   :  { %1731 = vmatpush3.bf16.msra.mxu1 %v2112_v31 }
 0xdc1   :  { %1732 = vmatprep.subr.bf16.mxu1 %v2003_v0 }
 0xdc4   :  { %1733 = vmatpush3.bf16.msra.mxu1 %v2117_v33 }
 0xdc5   :  { %1758 = vmatprep.subr.bf16.mxu1 %v2003_v0 }
 0xe77   :  { %v977_v59 = vpop.f32.mrf.mxu1 }
 0xe78   :  { %v984_v60 = vrot.slane %v977_v59, 6  ;;  %v911_v61 = vpop.f32.mrf.mxu0 }
 0xe79   :  { %v912_v62 = vadd.f32 %v2145_v39, %v911_v61  ;;  %v1724_v63 = vpop.f32.mrf.mxu1 }
 0xe7a   :  { %v986_v1 = vadd.f32 %v984_v60, %v2097_v12  ;;  %v1716_v2 = vpop.f32.mrf.mxu0 }
 0xe7b   :  { %1876 = vtanh.f32 %v912_v62  ;;  %v980_v4 = vpop.f32.mrf.mxu1  ;;  %v1526_v13 = vmul.f32 -1.442695, %v912_v62 }
 0xe7c   :  { %1878 = vtanh.f32 %v986_v1  ;;  %v914_v6 = vpop.f32.mrf.mxu0  ;;  %v1528_v14 = vmul.f32 -1.442695, %v986_v1 }
 0xe7d   :  { %v1725_v7 = vpop.f32.mrf.mxu1  ;;  %1880 = vpow2.f32 %v1526_v13 }
 0xe7e   :  { %v1717_v8 = vpop.f32.mrf.mxu0  ;;  %1882 = vpow2.f32 %v1528_v14 }
 0xe88   :  { %v1877_v10 = vpop.eup %1876 }
 0xe89   :  { %v1879_v11 = vpop.eup %1878  ;;  %926 = vrot.lane.b32.xlu1 %v1877_v10, %s2000_s30 }
 0xe8a   :  { %999 = vrot.lane.b32.xlu0 %v1879_v11, %s2000_s30  ;;  %v1881_v15 = vpop.eup %1880 }
 0xe8b   :  { %v1883_v16 = vpop.eup %1882  ;;  %v920_v17 = vadd.f32 1.0, %v1881_v15 }
 0xe8c   :  { %v990_v18 = vadd.f32 1.0, %v1883_v16 }
 0xe8d   :  { %1884 = vrcp.f32 %v920_v17 }
 0xe8e   :  { %1886 = vrcp.f32 %v990_v18 }
 0xe9a   :  { %v1885_v19 = vpop.eup %1884 }
 0xe9b   :  { %v1887_v21 = vpop.eup %1886  ;;  %v924_v26 = vmul.f32 %v1885_v19, %v2268_v45 }
 0xe9c   :  { %v997_v28 = vmul.f32 %v1887_v21, %v995_v25 }
 0xefb   :  { %v927_v20 = vpop.permute.xlu1 %926 }
 0xefc   :  { %v929_v22 = vmul.f32 %v1885_v19, %v927_v20  ;;  %v1000_v23 = vpop.permute.xlu0 %999 }
 0xefd   :  { %v1002_v24 = vmul.f32 %v1887_v21, %v1000_v23 }
 0xefe   :  { %931 = vrot.lane.b32.xlu1 %v929_v22, %s2006_s3 }
 0xeff   :  { %1004 = vrot.lane.b32.xlu0 %v1002_v24, %s2006_s3 }
 0xf70   :  { %v932_v27 = vpop.permute.xlu1 %931 }
 0xf71   :  { %v2305_v32 = vadd.f32 %v932_v27, %v924_v26  ;;  %v1005_v34 = vpop.permute.xlu0 %1004 }
 0xf72   :  { %v2307_v35 = vadd.f32 %v1005_v34, %v997_v28 }
 0xf73   :  { %1888 = vtanh.f32 %v2305_v32 }
 0xf74   :  { %1890 = vtanh.f32 %v2307_v35  ;;  %v1153_v16 = vrot.slane %v2307_v35, 6 }
 0xf80   :  { %v1889_v36 = vpop.eup %1888 }
 0xf81   :  { %v1891_v37 = vpop.eup %1890  ;;  %937 = vrot.lane.b32.xlu1 %v1889_v36, %s2000_s30 }
 0xf82   :  { %1010 = vrot.lane.b32.xlu0 %v1891_v37, %s2000_s30 }
 0xff3   :  { %v938_v38 = vpop.permute.xlu1 %937 }
 0xff4   :  { %v940_v40 = vmul.f32 %v1885_v19, %v938_v38  ;;  %v1011_v41 = vpop.permute.xlu0 %1010 }
 0xff5   :  { %v1013_v42 = vmul.f32 %v1887_v21, %v1011_v41 }
 0xff6   :  { %v1015_v43 = vpack.c.bf16 %v940_v40, %v940_v40 }
 0xff7   :  { %v1014_v44 = vpack.c.bf16 %v1013_v42, %v1013_v42 }
 0xff8   :  { %v1020_v9 = vrot.slane %v1015_v43, 7 }
 0xff9   :  { %1017 = vrot.lane.b32.xlu1 %v1014_v44, %s2006_s3  ;;  %v1095_v45 = vrot.slane %v1014_v44, 1 }
 0xffa   :  { %1021 = vrot.lane.b32.xlu0 %v1020_v9, %s2000_s30 }
 0xffd   :  { %1096 = vrot.lane.b32.xlu1 %v1095_v45, %s2006_s3 }
0x106b   :  { %v1018_v46 = vpop.permute.xlu1 %1017 }
0x106c   :  { %v1022_v47 = vpop.permute.xlu0 %1021 }
0x106d   :  { %v1025_v48 = vsel %vm154_vm3, %v1018_v46, %v1022_v47 }
0x106e   :  { %v1027_v49 = vrot.slane %v1025_v48, 1 }
0x106f   :  { %v1097_v50 = vpop.permute.xlu1 %1096 }
0x1070   :  { %1735 = vmatmul.mubr.msk.bf16.vlgmr.msra.gmra.mxu1 %vm253_vm4, %v1027_v49  ;;  %1743 = vmatmul.mubr.msk.bf16.vlgmr.msra.gmra.mxu0 %vm154_vm3, %v1097_v50 }
0x1071   :  { %1747 = vmatpush3.bf16.msra.mxu0 %v2105_v29  ;;  %1759 = vmatpush3.bf16.msra.mxu1 %v2072_v3 }
0x1072   :  { %1748 = vmatprep.subr.bf16.mxu0 %v2003_v0  ;;  %1760 = vmatprep.subr.bf16.mxu1 %v2003_v0 }
0x1073   :  { %1754 = vmatprep.mubr.msk.bf16.mxu0 %vm2004_vm0, %v2003_v0  ;;  %1762 = vmatprep.mubr.msk.bf16.mxu1 %vm2004_vm0, %v2003_v0 }
0x1075   :  { %1749 = vmatpush3.bf16.msra.mxu0 %v2108_v30  ;;  %1761 = vmatpush3.bf16.msra.mxu1 %v2078_v5 }
0x1076   :  { %1750 = vmatprep.subr.bf16.mxu0 %v2003_v0  ;;  %1766 = vmatprep.subr.bf16.mxu1 %v2003_v0 }
0x1079   :  { %1751 = vmatpush3.bf16.msra.mxu0 %v2112_v31 }
0x107a   :  { %1752 = vmatprep.subr.bf16.mxu0 %v2003_v0 }
0x107d   :  { %1753 = vmatpush3.bf16.msra.mxu0 %v2117_v33 }
0x107e   :  { %1778 = vmatprep.subr.bf16.mxu0 %v2003_v0 }
0x1130   :  { %v1065_v3 = vpop.f32.mrf.mxu1  ;;  %v1135_v51 = vpop.f32.mrf.mxu0 }
0x1131   :  { %v1066_v52 = vadd.f32 %v2145_v39, %v1065_v3  ;;  %v1142_v53 = vrot.slane %v1135_v51, 4 }
0x1132   :  { %v1736_v54 = vpop.f32.mrf.mxu1  ;;  %v1744_v55 = vpop.f32.mrf.mxu0 }
0x1133   :  { %1892 = vtanh.f32 %v1066_v52  ;;  %v1144_v5 = vadd.f32 %v1142_v53, %v2097_v12  ;;  %v1530_v62 = vmul.f32 -1.442695, %v1066_v52 }
0x1134   :  { %v1068_v56 = vpop.f32.mrf.mxu1  ;;  %v1138_v57 = vpop.f32.mrf.mxu0 }
0x1135   :  { %1894 = vtanh.f32 %v1144_v5  ;;  %v1532_v63 = vmul.f32 -1.442695, %v1144_v5 }
0x1136   :  { %v1737_v58 = vpop.f32.mrf.mxu1  ;;  %v1745_v59 = vpop.f32.mrf.mxu0  ;;  %1896 = vpow2.f32 %v1530_v62 }
0x1137   :  { %1898 = vpow2.f32 %v1532_v63 }
0x1140   :  { %v1893_v60 = vpop.eup %1892 }
0x1141   :  { %1080 = vrot.lane.b32.xlu0 %v1893_v60, %s2000_s30 }
0x1142   :  { %v1895_v61 = vpop.eup %1894 }
0x1143   :  { %1157 = vrot.lane.b32.xlu1 %v1895_v61, %s2000_s30  ;;  %v1897_v1 = vpop.eup %1896 }
0x1144   :  { %v1899_v2 = vpop.eup %1898  ;;  %v1074_v4 = vadd.f32 1.0, %v1897_v1 }
0x1145   :  { %v1148_v6 = vadd.f32 1.0, %v1899_v2 }
0x1146   :  { %1900 = vrcp.f32 %v1074_v4 }
0x1147   :  { %1902 = vrcp.f32 %v1148_v6 }
0x1153   :  { %v1901_v7 = vpop.eup %1900 }
0x1154   :  { %v1903_v11 = vpop.eup %1902  ;;  %v1078_v15 = vmul.f32 %v1901_v7, %v2305_v32 }
0x1155   :  { %v1155_v19 = vmul.f32 %v1903_v11, %v1153_v16 }
0x11b3   :  { %v1081_v8 = vpop.permute.xlu0 %1080 }
0x11b4   :  { %v1083_v10 = vmul.f32 %v1901_v7, %v1081_v8 }
0x11b5   :  { %v1158_v13 = vpop.permute.xlu1 %1157 }
0x11b6   :  { %1085 = vrot.lane.b32.xlu0 %v1083_v10, %s2006_s3  ;;  %v1160_v14 = vmul.f32 %v1903_v11, %v1158_v13 }
0x11b8   :  { %1162 = vrot.lane.b32.xlu1 %v1160_v14, %s2006_s3 }
0x1228   :  { %v1086_v17 = vpop.permute.xlu0 %1085 }
0x1229   :  { %v2343_v18 = vadd.f32 %v1086_v17, %v1078_v15 }
0x122a   :  { %v1163_v20 = vpop.permute.xlu1 %1162 }
0x122b   :  { %1904 = vtanh.f32 %v2343_v18  ;;  %v2346_v21 = vadd.f32 %v1163_v20, %v1155_v19  ;;  %v1932_v20 = vld [vmem:[%s2408_s5] ss:$0 sm:$0xff] }
0x122d   :  { %1906 = vtanh.f32 %v2346_v21  ;;  %v1311_v59 = vrot.slane %v2346_v21, 6 }
0x1238   :  { %v1905_v22 = vpop.eup %1904 }
0x1239   :  { %1091 = vrot.lane.b32.xlu0 %v1905_v22, %s2000_s30 }
0x123a   :  { %v1907_v23 = vpop.eup %1906 }
0x123b   :  { %1168 = vrot.lane.b32.xlu1 %v1907_v23, %s2000_s30 }
0x12ab   :  { %v1092_v24 = vpop.permute.xlu0 %1091 }
0x12ac   :  { %v1094_v25 = vmul.f32 %v1901_v7, %v1092_v24 }
0x12ad   :  { %v1169_v27 = vpop.permute.xlu1 %1168 }
0x12ae   :  { %v1173_v26 = vpack.c.bf16 %v1094_v25, %v1094_v25  ;;  %v1171_v28 = vmul.f32 %v1903_v11, %v1169_v27 }
0x12b0   :  { %v1178_v32 = vrot.slane %v1173_v26, 6  ;;  %v1172_v34 = vpack.c.bf16 %v1171_v28, %v1171_v28 }
0x12b2   :  { %1179 = vrot.lane.b32.xlu1 %v1178_v32, %s2000_s30  ;;  %1175 = vrot.lane.b32.xlu0 %v1172_v34, %s2006_s3  ;;  %v1253_v35 = vrot.slane %v1172_v34, 2 }
0x12b6   :  { %1254 = vrot.lane.b32.xlu0 %v1253_v35, %s2006_s3 }
0x1324   :  { %v1180_v36 = vpop.permute.xlu1 %1179  ;;  %v1176_v37 = vpop.permute.xlu0 %1175 }
0x1325   :  { %v1183_v38 = vsel %vm154_vm3, %v1176_v37, %v1180_v36 }
0x1326   :  { %v1185_v40 = vrot.slane %v1183_v38, 2 }
0x1328   :  { %1755 = vmatmul.mubr.msk.bf16.vlgmr.msra.gmra.mxu0 %vm253_vm4, %v1185_v40  ;;  %v1255_v41 = vpop.permute.xlu0 %1254  ;;  %v1802_v40 = vld [vmem:[%s2409_s6 + $0x8] sm:$0xff]  }
0x1329   :  { %1763 = vmatmul.mubr.msk.bf16.vlgmr.msra.gmra.mxu1 %vm154_vm3, %v1255_v41  ;;  %1782 = vmatprep.mubr.msk.bf16.mxu0 %vm2004_vm0, %v2003_v0  ;;  %v1803_v41 = vld [vmem:[%s2409_s6] sm:$0xff]   ;;  %s1488_s6 = sshll.u32 %s2007_s28, 4  ;;  %s1489_s6 = int_to_ptr.vmem [resolvable:$true] %s1488_s6 }
0x132a   :  { %1767 = vmatpush3.bf16.msra.mxu1 %v2105_v29  ;;  %1774 = vmatprep.mubr.msk.bf16.mxu1 %vm2004_vm0, %v2003_v0  ;;  %s1973_s29 = scalar_lea.vmem %s1489_s6, 32  ;;  %p1978_p11 = scmp.lt.s32.totalorder %s1489_s6, %s1489_s6 }
0x132b   :  { %1768 = vmatprep.subr.bf16.mxu1 %v2003_v0  ;;  %1779 = vmatpush3.bf16.msra.mxu0 %v1802_v40  ;;  %p1974_p10 = scmp.ne.s32.totalorder %s1489_s6, %s1973_s29  ;;  %p1979_p12 = scmp.lt.s32.totalorder %s1973_s29, %s1973_s29 }
0x132c   :  { %1780 = vmatprep.subr.bf16.mxu0 %v2003_v0 }
0x132d   :  { %p1980_p13 = por %p1979_p12, %p1978_p11 }
0x132e   :  { %1769 = vmatpush3.bf16.msra.mxu1 %v2108_v30 }
0x132f   :  { %1770 = vmatprep.subr.bf16.mxu1 %v2003_v0  ;;  %1781 = vmatpush3.bf16.msra.mxu0 %v1803_v41  ;;  %p1981_p0 = pnand %p1980_p13, %p1974_p10 }
0x1332   :  { %1771 = vmatpush3.bf16.msra.mxu1 %v2112_v31 }
0x1333   :  { %1772 = vmatprep.subr.bf16.mxu1 %v2003_v0 }
0x1336   :  { %1773 = vmatpush3.bf16.msra.mxu1 %v2117_v33 }
0x13e8   :  { %v1223_v42 = vpop.f32.mrf.mxu0 }
0x13e9   :  { %v1224_v43 = vadd.f32 %v2145_v39, %v1223_v42  ;;  %v1293_v44 = vpop.f32.mrf.mxu1 }
0x13ea   :  { %v1300_v29 = vrot.slane %v1293_v44, 2  ;;  %v1756_v9 = vpop.f32.mrf.mxu0 }
0x13eb   :  { %1908 = vtanh.f32 %v1224_v43  ;;  %v1764_v45 = vpop.f32.mrf.mxu1  ;;  %v1534_v33 = vmul.f32 -1.442695, %v1224_v43 }
0x13ec   :  { %v1302_v46 = vadd.f32 %v1300_v29, %v2097_v12  ;;  %v1226_v47 = vpop.f32.mrf.mxu0  ;;  %v1539_v45 = vld [vmem:[%s2410_s7] ss:$0 sm:$0xff] }
0x13ed   :  { %v1296_v30 = vpop.f32.mrf.mxu1 }
0x13ee   :  { %1910 = vtanh.f32 %v1302_v46  ;;  %v1757_v48 = vpop.f32.mrf.mxu0  ;;  %v1536_v39 = vmul.f32 -1.442695, %v1302_v46 }
0x13ef   :  { %v1765_v49 = vpop.f32.mrf.mxu1  ;;  %1912 = vpow2.f32 %v1534_v33 }
0x13f0   :  { %1914 = vpow2.f32 %v1536_v39 }
0x13f8   :  { %v1909_v31 = vpop.eup %1908 }
0x13f9   :  { %1238 = vrot.lane.b32.xlu1 %v1909_v31, %s2000_s30 }
0x13fb   :  { %v1911_v50 = vpop.eup %1910 }
0x13fc   :  { %1315 = vrot.lane.b32.xlu0 %v1911_v50, %s2000_s30  ;;  %v1913_v3 = vpop.eup %1912 }
0x13fd   :  { %v1915_v51 = vpop.eup %1914  ;;  %v1232_v52 = vadd.f32 1.0, %v1913_v3 }
0x13fe   :  { %v1306_v53 = vadd.f32 1.0, %v1915_v51 }
0x13ff   :  { %1916 = vrcp.f32 %v1232_v52 }
0x1400   :  { %1918 = vrcp.f32 %v1306_v53 }
0x140c   :  { %v1917_v12 = vpop.eup %1916 }
0x140d   :  { %v1919_v5 = vpop.eup %1918  ;;  %v1236_v58 = vmul.f32 %v1917_v12, %v2343_v18 }
0x140e   :  { %v1313_v62 = vmul.f32 %v1919_v5, %v1311_v59 }
0x146b   :  { %v1239_v54 = vpop.permute.xlu1 %1238 }
0x146c   :  { %v1241_v55 = vmul.f32 %v1917_v12, %v1239_v54 }
0x146e   :  { %1243 = vrot.lane.b32.xlu1 %v1241_v55, %s2006_s3  ;;  %v1316_v56 = vpop.permute.xlu0 %1315 }
0x146f   :  { %v1318_v57 = vmul.f32 %v1919_v5, %v1316_v56 }
0x1471   :  { %1320 = vrot.lane.b32.xlu0 %v1318_v57, %s2006_s3 }
0x14e0   :  { %v1244_v60 = vpop.permute.xlu1 %1243 }
0x14e1   :  { %v1246_v61 = vadd.f32 %v1244_v60, %v1236_v58 }
0x14e3   :  { %1920 = vtanh.f32 %v1246_v61  ;;  %v1321_v63 = vpop.permute.xlu0 %1320 }
0x14e4   :  { %v1323_v1 = vadd.f32 %v1321_v63, %v1313_v62 }
0x14e6   :  { %1922 = vtanh.f32 %v1323_v1 }
0x14f0   :  { %v1921_v2 = vpop.eup %1920 }
0x14f1   :  { %1249 = vrot.lane.b32.xlu1 %v1921_v2, %s2000_s30 }
0x14f3   :  { %v1923_v4 = vpop.eup %1922 }
0x14f4   :  { %1326 = vrot.lane.b32.xlu0 %v1923_v4, %s2000_s30 }
0x1563   :  { %v1250_v6 = vpop.permute.xlu1 %1249 }
0x1564   :  { %v1252_v7 = vmul.f32 %v1917_v12, %v1250_v6 }
0x1566   :  { %v1331_v8 = vpack.c.bf16 %v1252_v7, %v1252_v7  ;;  %v1327_v10 = vpop.permute.xlu0 %1326 }
0x1567   :  { %v1329_v11 = vmul.f32 %v1919_v5, %v1327_v10 }
0x1568   :  { %v1336_v13 = vrot.slane %v1331_v8, 5 }
0x1569   :  { %v1330_v14 = vpack.c.bf16 %v1329_v11, %v1329_v11 }
0x156a   :  { %1337 = vrot.lane.b32.xlu0 %v1336_v13, %s2000_s30 }
0x156b   :  { %1333 = vrot.lane.b32.xlu1 %v1330_v14, %s2006_s3 }
0x15dc   :  { %v1338_v15 = vpop.permute.xlu0 %1337 }
0x15dd   :  { %v1334_v16 = vpop.permute.xlu1 %1333 }
0x15de   :  { %v1341_v17 = vsel %vm154_vm3, %v1334_v16, %v1338_v15 }
0x15df   :  { %v1343_v18 = vrot.slane %v1341_v17, 3 }
0x15e1   :  { %1775 = vmatmul.mubr.msk.bf16.vlgmr.msra.gmra.mxu1 %vm253_vm4, %v1343_v18 }
0x16a1   :  { %v1381_v19 = vpop.f32.mrf.mxu1 }
0x16a2   :  { %v1382_v21 = vadd.f32 %v1932_v20, %v1381_v19 }
0x16a3   :  { %v1776_v22 = vpop.f32.mrf.mxu1 }
0x16a4   :  { %1924 = vtanh.f32 %v1382_v21  ;;  %v1538_v26 = vmul.f32 -1.442695, %v1382_v21 }
0x16a5   :  { %v1384_v23 = vpop.f32.mrf.mxu1 }
0x16a6   :  { %1926 = vpow2.f32 %v1538_v26 }
0x16a7   :  { %v1777_v24 = vpop.f32.mrf.mxu1 }
0x16b1   :  { %v1925_v25 = vpop.eup %1924 }
0x16b2   :  { %1396 = vrot.lane.b32.xlu1 %v1925_v25, %s2000_s30 }
0x16b3   :  { %v1927_v27 = vpop.eup %1926 }
0x16b4   :  { %v1390_v28 = vadd.f32 1.0, %v1927_v27 }
0x16b6   :  { %1928 = vrcp.f32 %v1390_v28 }
0x16c3   :  { %v1929_v32 = vpop.eup %1928 }
0x16c4   :  { %v1394_v36 = vmul.f32 %v1929_v32, %v1246_v61 }
0x1724   :  { %v1397_v34 = vpop.permute.xlu1 %1396 }
0x1725   :  { %v1399_v35 = vmul.f32 %v1929_v32, %v1397_v34 }
0x1727   :  { %1401 = vrot.lane.b32.xlu0 %v1399_v35, %s2006_s3 }
0x1799   :  { %v1402_v37 = vpop.permute.xlu0 %1401 }
0x179a   :  { %v1404_v38 = vadd.f32 %v1402_v37, %v1394_v36 }
0x179c   :  { %1930 = vtanh.f32 %v1404_v38 }
0x17a9   :  { %v1931_v42 = vpop.eup %1930 }
0x17aa   :  { %1407 = vrot.lane.b32.xlu1 %v1931_v42, %s2000_s30 }
0x181c   :  { %v1408_v43 = vpop.permute.xlu1 %1407 }
0x181d   :  { %v1410_v44 = vmul.f32 %v1929_v32, %v1408_v43 }
0x181f   :  { %v1411_v29 = vpack.c.bf16 %v1410_v44, %v1410_v44 }
0x1821   :  { %1424 = vrot.lane.b32.xlu0 %v1411_v29, %s2006_s3 }
0x1893   :  { %v1425_v9 = vpop.permute.xlu0 %1424 }
0x1894   :  { %1783 = vmatmul.mubr.msk.bf16.vlgmr.msra.gmra.mxu0 %vm154_vm3, %v1425_v9 }
0x1954   :  { %v1475_v46 = vpop.f32.mrf.mxu0 }
0x1955   :  { %v1476_v0 = vadd.f32 %v1539_v45, %v1475_v46 }
0x1956   :  { %v1784_v47 = vpop.f32.mrf.mxu0 }
0x1957   :  { %1481 = vst [vmem:[#allocation7] sm:$0x3] %v1476_v0 }
0x1958   :  { %v1478_v30 = vpop.f32.mrf.mxu0 }
0x1959   :  { %1984 = shalt.err (!%p1981_p0)
}
0x195a   :  { %1491 = dma.vmem_to_hbm [thread:$0]  %s1489_s6, 32, %s2411_s8, [#allocation4]   ;;  %v1785_v48 = vpop.f32.mrf.mxu0 }
0x195b   :  { %1997 = dma.done.wait [#allocation4], 32  }
0x195c   :  { %1998 = vsyncadd [#allocation4], 4294967264 }
0x195d   :  { %1495 = vsyncpa [#allocation3], 1 }
0x195e   :  { %1496 = vsyncpa [#allocation6], 1 }
0x195f   :  { %1497 = vsyncpa [#allocation4], 1 }

</bundles_post_ra>
